<compile_context>
chip_gen: v5e
topology: v5e:2x2
jax: 0.10.0
libtpu: 0.0.40
codegen_flags: <defaults>
</compile_context>

<pallas_src>
import functools

import jax
import jax.numpy as jnp
from jax.experimental import pallas as pl
from jax.experimental.pallas import tpu as pltpu


def _dcnn_kernel(p_ref, w1_ref, w2_ref, b2_ref, o_ref, *, ho, wo_pad, ah, aw):
    # ---- conv1 (+ bias via ones column) as one MXU matmul, then ReLU ----
    h = jnp.dot(p_ref[...], w1_ref[...], preferred_element_type=jnp.float32)
    h = jnp.maximum(h, 0.0)                          # (ho*wo_pad, 16)
    h3 = h.reshape(ho, wo_pad, h.shape[-1])          # (17, 24, 16); cols >= 17 unused

    # ---- conv2: k=2, s=2, p=1 -> each output pixel gets exactly one tap ----
    # y[2i+ph, 2j+pw] = <h[i+ph, j+pw, :], w2[:, 0, 1-ph, 1-pw]> + b2
    parts = []
    for ph in range(2):
        for pw in range(2):
            slab = h3[ph:ph + ah, pw:pw + aw, :]          # (ah, aw, 16)
            tap = w2_ref[2 * ph + pw:2 * ph + pw + 1, :]  # (1, 16)
            parts.append(jnp.sum(slab * tap, axis=-1))    # (ah, aw)  (VPU+XLU)
    y = jnp.concatenate(parts, axis=-1) + b2_ref[0]       # (ah, 4*aw), lane-dense
    o_ref[...] = y.astype(o_ref.dtype)


def dcnn_forward(x_nchw, params):
    w1, b1, w2, b2 = params
    n, cin, hh, ww = x_nchw.shape
    c1 = w1.shape[1]          # 16
    k1 = w1.shape[2]          # 3

    x = jnp.transpose(x_nchw, (0, 2, 3, 1)).astype(jnp.float32)   # NCHW -> NHWC

    # ---- conv1 im2col (zero-insertion upsample + pad(k-1) + flattened taps) ----
    ho, wo = 2 * hh + 1, 2 * ww + 1                 # 17, 17
    wo_pad = ((wo + 7) // 8) * 8                    # 24 -> clean in-kernel reshape
    u = jnp.zeros((n, 2 * hh - 1, 2 * ww - 1, cin), jnp.float32)
    u = u.at[:, ::2, ::2, :].set(x)
    u1p = jnp.pad(u, ((0, 0),
                      (2, ho + k1 - 1 - (2 * hh - 1) - 2),
                      (2, wo_pad + k1 - 1 - (2 * ww - 1) - 2),
                      (0, 0)))
    taps = [u1p[:, i:i + ho, j:j + wo_pad, :] for i in range(k1) for j in range(k1)]
    patches = jnp.concatenate(taps, axis=-1)                       # (n, ho, wo_pad, 9*cin)
    ones = jnp.ones(patches.shape[:-1] + (1,), jnp.float32)        # bias column
    patches = jnp.concatenate([patches, ones], axis=-1)
    kdim = k1 * k1 * cin + 1                                       # 289
    patches = patches.reshape(n, ho * wo_pad, kdim)                # (n, 408, 289)

    # flipped conv1 weight flattened to (9*cin, c1); bias folded as the last row
    w1c = jnp.flip(jnp.transpose(w1, (2, 3, 0, 1)), axis=(0, 1))   # (3,3,cin,c1)
    w1f = jnp.concatenate(
        [w1c.reshape(k1 * k1 * cin, c1),
         b1.reshape(1, c1).astype(jnp.float32)], axis=0)           # (289, 16)

    # conv2 polyphase taps: phase (ph, pw) uses w2[:, 0, 1-ph, 1-pw]
    w2t = jnp.stack([w2[:, 0, 1 - ph, 1 - pw]
                     for ph in (0, 1) for pw in (0, 1)], axis=0)   # (4, 16)
    b2s = b2.reshape(1).astype(jnp.float32)

    ah, aw = 2 * hh, 2 * ww                                        # (16, 16)
    kernel = functools.partial(_dcnn_kernel, ho=ho, wo_pad=wo_pad, ah=ah, aw=aw)

    yk = pl.pallas_call(
        kernel,
        out_shape=jax.ShapeDtypeStruct((n, ah, 4 * aw), jnp.float32),
        grid_spec=pltpu.PrefetchScalarGridSpec(
            num_scalar_prefetch=0,
            grid=(n,),
            in_specs=[
                pl.BlockSpec((None, ho * wo_pad, kdim), lambda i: (i, 0, 0)),
                pl.BlockSpec((kdim, c1), lambda i: (0, 0)),
                pl.BlockSpec((4, c1), lambda i: (0, 0)),
                pl.BlockSpec(memory_space=pltpu.MemorySpace.SMEM),
            ],
            out_specs=pl.BlockSpec((None, ah, 4 * aw), lambda i: (i, 0, 0)),
        ),
        compiler_params=pltpu.CompilerParams(
            dimension_semantics=("parallel",)),
    )(patches, w1f, w2t, b2s)

    # un-interleave the four conv2 phases: yk[n, i, (2*ph+pw)*aw + j] = y[n, 2i+ph, 2j+pw]
    y = yk.reshape(n, ah, 2, 2, aw).transpose(0, 1, 2, 4, 3)
    return y.reshape(n, 1, 2 * ah, 2 * aw)                         # NCHW, Cout=1


# ---------------- pure-XLA reference (for correctness check) ----------------
def _ref_conv_transpose2d(x, w_t, b, stride, padding):
    k = w_t.shape[2]
    w_conv = jnp.flip(jnp.transpose(w_t, (1, 0, 2, 3)), axis=(2, 3))  # OIHW
    pad = k - 1 - padding
    y = jax.lax.conv_general_dilated(
        x, w_conv, window_strides=(1, 1),
        padding=((pad, pad), (pad, pad)),
        lhs_dilation=(stride, stride),
        dimension_numbers=("NCHW", "OIHW", "NCHW"))
    return y + b.reshape(1, -1, 1, 1)


def dcnn_reference(x_nchw, params):
    w1, b1, w2, b2 = params
    h = jax.nn.relu(_ref_conv_transpose2d(x_nchw, w1, b1, stride=2, padding=0))
    return _ref_conv_transpose2d(h, w2, b2, stride=2, padding=1)


if __name__ == "__main__":
    key = jax.random.PRNGKey(0)
    kx, k1, k2, k3, k4 = jax.random.split(key, 5)

    N, Cin, H, W = 2, 32, 8, 8
    x = jax.random.normal(kx, (N, Cin, H, W), jnp.float32)

    # PyTorch ConvTranspose2d weight layout: (Cin, Cout, KH, KW)
    w1 = 0.1 * jax.random.normal(k1, (32, 16, 3, 3), jnp.float32)
    b1 = 0.1 * jax.random.normal(k2, (16,), jnp.float32)
    w2 = 0.1 * jax.random.normal(k3, (16, 1, 2, 2), jnp.float32)
    b2 = 0.1 * jax.random.normal(k4, (1,), jnp.float32)
    params = (w1, b1, w2, b2)

    y = jax.jit(dcnn_forward)(x, params)
    y = jax.block_until_ready(y)

    # dconv1: 8 -> 2*8+1 = 17 ; dconv2: 17 -> 2*17 - 2 = 32
    assert y.shape == (N, 1, 32, 32), y.shape

    y_ref = dcnn_reference(x, params)
    assert jnp.allclose(y, y_ref, atol=1e-3, rtol=1e-3), float(
        jnp.max(jnp.abs(y - y_ref)))

    print("KERNEL_OK")
</pallas_src>

<mosaic_0001>
module attributes {stable_mosaic.version = 11 : i64} {
  func.func @_dcnn_kernel(%arg0: i32, %arg1: memref<1x408x289xf32, #tpu.memory_space<vmem>>, %arg2: memref<289x16xf32, #tpu.memory_space<vmem>>, %arg3: memref<4x16xf32, #tpu.memory_space<vmem>>, %arg4: memref<1xf32, #tpu.memory_space<smem>>, %arg5: memref<1x16x64xf32, #tpu.memory_space<vmem>>) attributes {dimension_semantics = [#tpu.dimension_semantics<parallel>], iteration_bounds = array<i64: 2>, scalar_prefetch = 0 : i64, scratch_operands = 0 : i64, tpu.core_type = #tpu.core_type<tc>, window_params = [{transform_indices = @transform_0, window_bounds = array<i64: 1, 408, 289>}, {pipeline_mode = #tpu.pipeline_mode<synchronous>, transform_indices = @transform_1, window_bounds = array<i64: 289, 16>}, {pipeline_mode = #tpu.pipeline_mode<synchronous>, transform_indices = @transform_2, window_bounds = array<i64: 4, 16>}, {transform_indices = @transform_3, window_bounds = array<i64: 1>}, {transform_indices = @transform_4, window_bounds = array<i64: 1, 16, 64>}]} {
    %c0 = arith.constant 0 : index
    %c0_0 = arith.constant 0 : index
    %c0_1 = arith.constant 0 : index
    %0 = vector.load %arg1[%c0, %c0_0, %c0_1] : memref<1x408x289xf32, #tpu.memory_space<vmem>>, vector<1x408x289xf32>
    %1 = vector.shape_cast %0 : vector<1x408x289xf32> to vector<408x289xf32>
    %c0_2 = arith.constant 0 : index
    %c0_3 = arith.constant 0 : index
    %2 = vector.load %arg2[%c0_2, %c0_3] : memref<289x16xf32, #tpu.memory_space<vmem>>, vector<289x16xf32>
    %cst = arith.constant dense<0.000000e+00> : vector<408x16xf32>
    %3 = tpu.matmul %1, %2, %cst {dimension_numbers = #tpu.dot_dimension_numbers<[1], [0], [0], [1], [0, 0, 1, 1], [], []>} : vector<408x289xf32>, vector<289x16xf32>, vector<408x16xf32> -> vector<408x16xf32>
    %cst_4 = arith.constant 0.000000e+00 : f32
    %4 = vector.broadcast %cst_4 : f32 to vector<408x16xf32>
    %5 = arith.maximumf %3, %4 : vector<408x16xf32>
    %6 = vector.shape_cast %5 : vector<408x16xf32> to vector<17x24x16xf32>
    %7 = vector.extract_strided_slice %6 {offsets = [0, 0, 0], sizes = [16, 16, 16], strides = [1, 1, 1]} : vector<17x24x16xf32> to vector<16x16x16xf32>
    %c0_5 = arith.constant 0 : index
    %c0_6 = arith.constant 0 : index
    %8 = vector.load %arg3[%c0_5, %c0_6] : memref<4x16xf32, #tpu.memory_space<vmem>>, vector<1x16xf32>
    %9 = vector.shape_cast %8 : vector<1x16xf32> to vector<1x1x16xf32>
    %10 = vector.broadcast %9 : vector<1x1x16xf32> to vector<16x16x16xf32>
    %11 = arith.mulf %7, %10 : vector<16x16x16xf32>
    %cst_7 = arith.constant dense<0.000000e+00> : vector<16x16xf32>
    %12 = vector.multi_reduction <add>, %11, %cst_7 [2] : vector<16x16x16xf32> to vector<16x16xf32>
    %13 = vector.extract_strided_slice %6 {offsets = [0, 1, 0], sizes = [16, 16, 16], strides = [1, 1, 1]} : vector<17x24x16xf32> to vector<16x16x16xf32>
    %c1 = arith.constant 1 : index
    %c0_8 = arith.constant 0 : index
    %14 = vector.load %arg3[%c1, %c0_8] : memref<4x16xf32, #tpu.memory_space<vmem>>, vector<1x16xf32>
    %15 = vector.shape_cast %14 : vector<1x16xf32> to vector<1x1x16xf32>
    %16 = vector.broadcast %15 : vector<1x1x16xf32> to vector<16x16x16xf32>
    %17 = arith.mulf %13, %16 : vector<16x16x16xf32>
    %cst_9 = arith.constant dense<0.000000e+00> : vector<16x16xf32>
    %18 = vector.multi_reduction <add>, %17, %cst_9 [2] : vector<16x16x16xf32> to vector<16x16xf32>
    %19 = vector.extract_strided_slice %6 {offsets = [1, 0, 0], sizes = [16, 16, 16], strides = [1, 1, 1]} : vector<17x24x16xf32> to vector<16x16x16xf32>
    %c2 = arith.constant 2 : index
    %c0_10 = arith.constant 0 : index
    %20 = vector.load %arg3[%c2, %c0_10] : memref<4x16xf32, #tpu.memory_space<vmem>>, vector<1x16xf32>
    %21 = vector.shape_cast %20 : vector<1x16xf32> to vector<1x1x16xf32>
    %22 = vector.broadcast %21 : vector<1x1x16xf32> to vector<16x16x16xf32>
    %23 = arith.mulf %19, %22 : vector<16x16x16xf32>
    %cst_11 = arith.constant dense<0.000000e+00> : vector<16x16xf32>
    %24 = vector.multi_reduction <add>, %23, %cst_11 [2] : vector<16x16x16xf32> to vector<16x16xf32>
    %25 = vector.extract_strided_slice %6 {offsets = [1, 1, 0], sizes = [16, 16, 16], strides = [1, 1, 1]} : vector<17x24x16xf32> to vector<16x16x16xf32>
    %c3 = arith.constant 3 : index
    %c0_12 = arith.constant 0 : index
    %26 = vector.load %arg3[%c3, %c0_12] : memref<4x16xf32, #tpu.memory_space<vmem>>, vector<1x16xf32>
    %27 = vector.shape_cast %26 : vector<1x16xf32> to vector<1x1x16xf32>
    %28 = vector.broadcast %27 : vector<1x1x16xf32> to vector<16x16x16xf32>
    %29 = arith.mulf %25, %28 : vector<16x16x16xf32>
    %cst_13 = arith.constant dense<0.000000e+00> : vector<16x16xf32>
    %30 = vector.multi_reduction <add>, %29, %cst_13 [2] : vector<16x16x16xf32> to vector<16x16xf32>
    %31 = tpu.concatenate %12, %18, %24, %30 in 1 : vector<16x16xf32>, vector<16x16xf32>, vector<16x16xf32>, vector<16x16xf32> -> vector<16x64xf32>
    %c0_14 = arith.constant 0 : index
    %32 = memref.load %arg4[%c0_14] : memref<1xf32, #tpu.memory_space<smem>>
    %33 = vector.broadcast %32 : f32 to vector<16x64xf32>
    %34 = arith.addf %31, %33 : vector<16x64xf32>
    %c0_15 = arith.constant 0 : index
    %c0_16 = arith.constant 0 : index
    %c0_17 = arith.constant 0 : index
    %35 = vector.load %arg5[%c0_15, %c0_16, %c0_17] : memref<1x16x64xf32, #tpu.memory_space<vmem>>, vector<1x16x64xf32>
    %36 = vector.shape_cast %35 : vector<1x16x64xf32> to vector<16x64xf32>
    %37 = vector.shape_cast %34 : vector<16x64xf32> to vector<1x16x64xf32>
    tpu.vector_store %arg5[%c0_15, %c0_16, %c0_17], %37 {strides = array<i32>} : memref<1x16x64xf32, #tpu.memory_space<vmem>>, vector<1x16x64xf32>,
    return
  }
  func.func @transform_0(%arg0: i32) -> (i32, i32, i32) {
    %c0_i32 = arith.constant 0 : i32
    %c0_i32_0 = arith.constant 0 : i32
    %c0_i32_1 = arith.constant 0 : i32
    return %arg0, %c0_i32, %c0_i32_0 : i32, i32, i32
  }
  func.func @transform_1(%arg0: i32) -> (i32, i32) {
    %c0_i32 = arith.constant 0 : i32
    %c0_i32_0 = arith.constant 0 : i32
    %c0_i32_1 = arith.constant 0 : i32
    return %c0_i32, %c0_i32_0 : i32, i32
  }
  func.func @transform_2(%arg0: i32) -> (i32, i32) {
    %c0_i32 = arith.constant 0 : i32
    %c0_i32_0 = arith.constant 0 : i32
    %c0_i32_1 = arith.constant 0 : i32
    return %c0_i32, %c0_i32_0 : i32, i32
  }
  func.func @transform_3(%arg0: i32) -> i32 {
    %c0_i32 = arith.constant 0 : i32
    %c0_i32_0 = arith.constant 0 : i32
    return %c0_i32 : i32
  }
  func.func @transform_4(%arg0: i32) -> (i32, i32, i32) {
    %c0_i32 = arith.constant 0 : i32
    %c0_i32_0 = arith.constant 0 : i32
    %c0_i32_1 = arith.constant 0 : i32
    return %arg0, %c0_i32, %c0_i32_0 : i32, i32, i32
  }
}

</mosaic_0001>

<bundles_post_ra>
// kernel: dcnn_forward.1
= control target key start
LH: loop header
LB: loop body
LE: loop exit
PB: predicated region body
PF: predicated region fallthrough
CT: control target
= control target key end

     0   :  { %s2490_s17 = smov 0   ;;  %s4091_s0 = inlined_call_operand.vmem [shape: f32[2,408,289], index: 0, kind: input, shape index: {}]   ;;  %s4092_s1 = inlined_call_operand.vmem [shape: f32[289,16], index: 1, kind: input, shape index: {}]   ;;  %s4093_s2 = inlined_call_operand.vmem [shape: f32[4,16], index: 2, kind: input, shape index: {}]   ;;  %s4094_s3 = inlined_call_operand.<no memory space> [shape: f32[1], index: 3, kind: input, shape index: {}]   ;;  %s4095_s4 = inlined_call_operand.vmem [shape: f32[2,16,64], index: 4, kind: output, shape index: {}]  }
   0x1   :  { %9 = sst [smem:[#allocation2]] %s4094_s3 }
   0x2 LB: > { %s2333_s18 = sadd.s32 4294967295, %s2460_s17   ;;  %p2337_p0 = scmp.ge.s32.totalorder %s2460_s17, 1  ;;  %s2460_s17 = sphi %s2490_s17, %s15_s17  }
   0x3   : > { %p163_p1 = scmp.lt.s32.totalorder %s2460_s17, 3 }
   0x5   : > { %p164_p2 = pnand %p2337_p0, %p163_p1 }
   0x7   : > { %167 = sbr.rel (%p164_p2) target bundleno = 738 (0x2e2), region = 36 }
   0xc   : > { %v367_v0 = vld [vmem:[%s4092_s1 + $0x78] sm:$0xff]  ;;  %v2509_v2 = vld [vmem:[%s4092_s1 + $0x120] sm:$0x1]  ;;  %vm543_vm0 = vcmask 1040384   ;;  %p189_p3 = scmp.lt.s32.totalorder %s2333_s18, 1  ;;  %v366_v3 = vld [vmem:[%s4092_s1 + $0x70] sm:$0xff] }
   0xd   : > { %v2504_v1 = vld [vmem:[%s4092_s1 + $0xf8] sm:$0xff]  ;;  %547 = vmatpush.msra.mxu0 %v367_v0  ;;  %2396 = vmatpush.msra.mxu3 %v367_v0  ;;  %v2517_v4 = vld [vmem:[%s4092_s1 + $0xf0] sm:$0xff]  ;;  %v365_v6 = vld [vmem:[%s4092_s1 + $0x68] sm:$0xff]  ;;  %vm389_vm1 = vcmask 269312   ;;  %vm1289_vm2 = vcmask 130049   ;;  %vm1142_vm3 = vcmask 130048  }
   0xe   : > { %v2522_v5 = vld [vmem:[%s4092_s1 + $0x118] sm:$0xff]  ;;  %717 = vmatpush.msra.mxu1 %v2504_v1  ;;  %2341 = vmatpush.msk.msra.mxu2 %vm543_vm0, %v2509_v2  ;;  %s4129_s18 = smov (!%p189_p3, %s2333_s18), 1  ;;  %v2535_v7 = vld [vmem:[%s4092_s1 + $0xe8] sm:$0xff]  ;;  %v2540_v8 = vld [vmem:[%s4092_s1 + $0x110] sm:$0xff]  ;;  %vm1296_vm4 = vcmask 122880   ;;  %vm1918_vm5 = vcmask 253112  }
   0xf   : > { %548 = vmatpush.msra.mxu0 %v366_v3  ;;  %2397 = vmatpush.msra.mxu3 %v366_v3  ;;  %v364_v9 = vld [vmem:[%s4092_s1 + $0x60] sm:$0xff]  ;;  %s2433_s12 = smul.u32 1224, %s4129_s18  ;;  %v2556_v11 = vld [vmem:[%s4092_s1 + $0x108] sm:$0xff]  ;;  %v363_v12 = vld [vmem:[%s4092_s1 + $0x58] sm:$0xff]  ;;  %vm1796_vm6 = vcmask 130112   ;;  %vm1922_vm7 = vcmask 318712  }
  0x10   : > { %718 = vmatpush.msra.mxu1 %v2517_v4  ;;  %899 = vmatpush.msra.mxu2 %v2522_v5  ;;  %v2551_v10 = vld [vmem:[%s4092_s1 + $0xe0] sm:$0xff]  ;;  %v2571_v13 = vld [vmem:[%s4092_s1 + $0xd8] sm:$0xff]  ;;  %v362_v16 = vld [vmem:[%s4092_s1 + $0x50] sm:$0xff]  ;;  %vm2051_vm8 = vcmask 392512   ;;  %vm1843_vm9 = vcmask 1041409   ;;  %vm1845_vm10 = vcmask 1042434  }
  0x11   : > { %549 = vmatpush.msra.mxu0 %v365_v6  ;;  %2398 = vmatpush.msra.mxu3 %v365_v6  ;;  %s2566_s22 = scalar_lea.vmem %s4091_s0, %s2433_s12  ;;  %v2576_v14 = vld [vmem:[%s4092_s1 + $0x100] sm:$0xff]  ;;  %v2587_v17 = vld [vmem:[%s4092_s1 + $0xd0] sm:$0xff]  ;;  %v361_v18 = vld [vmem:[%s4092_s1 + $0x48] sm:$0xff]  ;;  %vm2166_vm11 = vcmask 515512   ;;  %vm2170_vm12 = vcmask 581112   ;;  %vm1847_vm13 = vcmask 1043459  }
  0x12   : > { %719 = vmatpush.msra.mxu1 %v2535_v7  ;;  %900 = vmatpush.msra.mxu2 %v2540_v8  ;;  %v201_v15 = vld [vmem:[%s2566_s22 + $0x10] sm:$0xff]  ;;  %v2598_v19 = vld [vmem:[%s4092_s1 + $0xc8] sm:$0xff]  ;;  %v360_v20 = vld [vmem:[%s4092_s1 + $0x40] sm:$0xff]  ;;  %vm1849_vm14 = vcmask 1044484   ;;  %vm4097_vm15 = vcmask 1045509   ;;  %s3723_s14 = sld [smem:[#allocation2]] }
  0x13   : > { %550 = vmatpush.msra.mxu0 %v364_v9  ;;  %2399 = vmatpush.msra.mxu3 %v364_v9  ;;  %v2607_v21 = vld [vmem:[%s4092_s1 + $0xc0] sm:$0xff]  ;;  %v359_v22 = vld [vmem:[%s4092_s1 + $0x38] sm:$0xff]  ;;  %v204_v24 = vld [vmem:[%s2566_s22 + $0x28] sm:$0xff]  ;;  %s2395_s19 = sshll.u32 %s4129_s18, 4 }
  0x14   : > { %720 = vmatpush.msra.mxu1 %v2551_v10  ;;  %901 = vmatpush.msra.mxu2 %v2556_v11  ;;  %v2616_v23 = vld [vmem:[%s4092_s1 + $0xb8] sm:$0xff]  ;;  %v358_v25 = vld [vmem:[%s4092_s1 + $0x30] sm:$0xff]  ;;  %v357_v27 = vld [vmem:[%s4092_s1 + $0x28] sm:$0xff]  ;;  %s3770_s3 = scalar_lea.vmem %s4095_s4, %s2395_s19 }
  0x15   : > { %551 = vmatpush.msra.mxu0 %v363_v12  ;;  %2400 = vmatpush.msra.mxu3 %v363_v12  ;;  %v2626_v26 = vld [vmem:[%s4092_s1 + $0xb0] sm:$0xff]  ;;  %v2636_v28 = vld [vmem:[%s4092_s1 + $0xa8] sm:$0xff]  ;;  %v356_v29 = vld [vmem:[%s4092_s1 + $0x20] sm:$0xff] }
  0x16   : > { %721 = vmatpush.msra.mxu1 %v2571_v13  ;;  %902 = vmatpush.msra.mxu2 %v2576_v14  ;;  %v2645_v30 = vld [vmem:[%s4092_s1 + $0xa0] sm:$0xff]  ;;  %v355_v31 = vld [vmem:[%s4092_s1 + $0x18] sm:$0xff]  ;;  %v354_v34 = vld [vmem:[%s4092_s1 + $0x10] sm:$0xff] }
  0x17   : > { %2342 = vmatmul.msk.f32.vlgmr.msra.gmra.mxu2 %vm389_vm1, %v201_v15  ;;  %552 = vmatpush.msra.mxu0 %v362_v16  ;;  %v2654_v32 = vld [vmem:[%s4092_s1 + $0x98] sm:$0xff]  ;;  %v207_v33 = vld [vmem:[%s2566_s22 + $0x40] sm:$0xff]  ;;  %v370_v35 = vld [vmem:[%s4092_s1 + $0x90] sm:$0xff] }
  0x18   : > { %2401 = vmatpush.msra.mxu3 %v362_v16  ;;  %722 = vmatpush.msra.mxu1 %v2587_v17  ;;  %v353_v36 = vld [vmem:[%s4092_s1 + $0x8] sm:$0xff]  ;;  %v352_v38 = vld [vmem:[%s4092_s1] sm:$0xff]  ;;  %v313_v41 = vld [vmem:[%s2566_s22 + $0x390] sm:$0xff] }
  0x19   : > { %553 = vmatpush.msra.mxu0 %v361_v18  ;;  %v369_v37 = vld [vmem:[%s4092_s1 + $0x88] sm:$0xff]  ;;  %v368_v39 = vld [vmem:[%s4092_s1 + $0x80] sm:$0xff]  ;;  %v210_v43 = vld [vmem:[%s2566_s22 + $0x58] sm:$0xff] }
  0x1a   : > { %2402 = vmatpush.msra.mxu3 %v361_v18  ;;  %723 = vmatpush.msra.mxu1 %v2598_v19  ;;  %v199_v40 = vld [vmem:[%s2566_s22] sm:$0xff]  ;;  %v200_v42 = vld [vmem:[%s2566_s22 + $0x8] sm:$0xff]  ;;  %v202_v44 = vld [vmem:[%s2566_s22 + $0x18] sm:$0xff] }
  0x1b   : > { %554 = vmatpush.msra.mxu0 %v360_v20  ;;  %v316_v45 = vld [vmem:[%s2566_s22 + $0x3a8] sm:$0xff]  ;;  %v203_v46 = vld [vmem:[%s2566_s22 + $0x20] sm:$0xff]  ;;  %v213_v47 = vld [vmem:[%s2566_s22 + $0x70] sm:$0xff] }
  0x1c   : > { %2403 = vmatpush.msra.mxu3 %v360_v20  ;;  %724 = vmatpush.msra.mxu1 %v2607_v21  ;;  %v205_v48 = vld [vmem:[%s2566_s22 + $0x30] sm:$0xff]  ;;  %v319_v49 = vld [vmem:[%s2566_s22 + $0x3c0] sm:$0xff]  ;;  %v206_v50 = vld [vmem:[%s2566_s22 + $0x38] sm:$0xff] }
  0x1d   : > { %555 = vmatpush.msra.mxu0 %v359_v22  ;;  %v216_v51 = vld [vmem:[%s2566_s22 + $0x88] sm:$0xff]  ;;  %v322_v53 = vld [vmem:[%s2566_s22 + $0x3d8] sm:$0xff]  ;;  %v209_v54 = vld [vmem:[%s2566_s22 + $0x50] sm:$0xff] }
  0x1e   : > { %2404 = vmatpush.msra.mxu3 %v359_v22  ;;  %725 = vmatpush.msra.mxu1 %v2616_v23  ;;  %v208_v52 = vld [vmem:[%s2566_s22 + $0x48] sm:$0xff]  ;;  %v219_v55 = vld [vmem:[%s2566_s22 + $0xa0] sm:$0xff]  ;;  %v325_v57 = vld [vmem:[%s2566_s22 + $0x3f0] sm:$0xff] }
  0x1f   : > { %2343 = vmatmul.msk.f32.gmra.mxu2 %vm389_vm1, %v204_v24  ;;  %556 = vmatpush.msra.mxu0 %v358_v25  ;;  %v211_v56 = vld [vmem:[%s2566_s22 + $0x60] sm:$0xff]  ;;  %v212_v58 = vld [vmem:[%s2566_s22 + $0x68] sm:$0xff]  ;;  %v222_v59 = vld [vmem:[%s2566_s22 + $0xb8] sm:$0xff] }
  0x20   : > { %2405 = vmatpush.msra.mxu3 %v358_v25  ;;  %726 = vmatpush.msra.mxu1 %v2626_v26  ;;  %v214_v60 = vld [vmem:[%s2566_s22 + $0x78] sm:$0xff]  ;;  %v328_v61 = vld [vmem:[%s2566_s22 + $0x408] sm:$0xff]  ;;  %v215_v62 = vld [vmem:[%s2566_s22 + $0x80] sm:$0xff] }
  0x21   : > { %557 = vmatpush.msra.mxu0 %v357_v27  ;;  %v225_v63 = vld [vmem:[%s2566_s22 + $0xd0] sm:$0xff]  ;;  %v228_v3 = vld [vmem:[%s2566_s22 + $0xe8] sm:$0xff]  ;;  %v226_v12 = vld [vmem:[%s2566_s22 + $0xd8] sm:$0xff] }
  0x22   : > { %2406 = vmatpush.msra.mxu3 %v357_v27  ;;  %727 = vmatpush.msra.mxu1 %v2636_v28  ;;  %v217_v0 = vld [vmem:[%s2566_s22 + $0x90] sm:$0xff]  ;;  %v230_v18 = vld [vmem:[%s2566_s22 + $0xf8] sm:$0xff]  ;;  %v232_v20 = vld [vmem:[%s2566_s22 + $0x108] sm:$0xff] }
  0x23   : > { %558 = vmatpush.msra.mxu0 %v356_v29  ;;  %v221_v6 = vld [vmem:[%s2566_s22 + $0xb0] sm:$0xff]  ;;  %v235_v24 = vld [vmem:[%s2566_s22 + $0x120] sm:$0xff]  ;;  %v246_v27 = vld [vmem:[%s2566_s22 + $0x178] sm:$0xff] }
  0x24   : > { %2407 = vmatpush.msra.mxu3 %v356_v29  ;;  %728 = vmatpush.msra.mxu1 %v2645_v30  ;;  %v337_v9 = vld [vmem:[%s2566_s22 + $0x450] sm:$0xff]  ;;  %v314_v29 = vld [vmem:[%s2566_s22 + $0x398] sm:$0xff] }
  0x25   : > { %559 = vmatpush.msra.mxu0 %v355_v31  ;;  %v237_v15 = vld [vmem:[%s2566_s22 + $0x130] sm:$0xff] }
  0x26   : > { %2408 = vmatpush.msra.mxu3 %v355_v31  ;;  %729 = vmatpush.msra.mxu1 %v2654_v32  ;;  %v229_v16 = vld [vmem:[%s2566_s22 + $0xf0] sm:$0xff] }
  0x27   : > { %2344 = vmatmul.msk.f32.gmra.mxu2 %vm389_vm1, %v207_v33  ;;  %560 = vmatpush.msra.mxu0 %v354_v34  ;;  %v233_v22 = vld [vmem:[%s2566_s22 + $0x110] sm:$0xff] }
  0x28   : > { %2409 = vmatpush.msra.mxu3 %v354_v34  ;;  %730 = vmatpush.msra.mxu1 %v370_v35  ;;  %v349_v25 = vld [vmem:[%s2566_s22 + $0x4b0] sm:$0xff] }
  0x29   : > { %561 = vmatpush.msra.mxu0 %v353_v36  ;;  %v249_v31 = vld [vmem:[%s2566_s22 + $0x190] sm:$0xff] }
  0x2a   : > { %2410 = vmatpush.msra.mxu3 %v353_v36  ;;  %731 = vmatpush.msra.mxu1 %v369_v37  ;;  %v317_v33 = vld [vmem:[%s2566_s22 + $0x3b0] sm:$0xff]  ;;  %v252_v36 = vld [vmem:[%s2566_s22 + $0x1a8] sm:$0xff] }
  0x2b   : > { %562 = vmatpush.msra.mxu0 %v352_v38  ;;  %v241_v34 = vld [vmem:[%s2566_s22 + $0x150] sm:$0xff] }
  0x2c   : > { %2411 = vmatpush.msra.mxu3 %v352_v38  ;;  %732 = vmatpush.msra.mxu1 %v368_v39  ;;  %v320_v38 = vld [vmem:[%s2566_s22 + $0x3c8] sm:$0xff] }
  0x2d   : > { %563 = vmatmul.f32.vlgmr.msra.gmra.mxu0 %v199_v40  ;;  %677 = vmatmul.f32.vlgmr.msra.gmra.mxu3 %v313_v41  ;;  %v245_v40 = vld [vmem:[%s2566_s22 + $0x170] sm:$0xff]  ;;  %v255_v41 = vld [vmem:[%s2566_s22 + $0x1c0] sm:$0xff] }
  0x2e   : > { %733 = vmatmul.f32.vlgmr.msra.gmra.mxu1 %v200_v42  ;;  %2412 = vmatpush.msrb.mxu3 %v2504_v1  ;;  %v331_v1 = vld [vmem:[%s2566_s22 + $0x420] sm:$0xff] }
  0x2f   : > { %2345 = vmatmul.msk.f32.gmra.mxu2 %vm389_vm1, %v210_v43 }
  0x30   : > { %2413 = vmatpush.msrb.mxu3 %v2517_v4  ;;  %v220_v4 = vld [vmem:[%s2566_s22 + $0xa8] sm:$0xff] }
  0x32   : > { %2414 = vmatpush.msrb.mxu3 %v2535_v7  ;;  %v231_v7 = vld [vmem:[%s2566_s22 + $0x100] sm:$0xff] }
  0x34   : > { %2415 = vmatpush.msrb.mxu3 %v2551_v10  ;;  %v224_v10 = vld [vmem:[%s2566_s22 + $0xc8] sm:$0xff] }
  0x35   : > { %566 = vmatmul.f32.gmra.mxu0 %v202_v44  ;;  %680 = vmatmul.f32.gmra.mxu3 %v316_v45  ;;  %v323_v44 = vld [vmem:[%s2566_s22 + $0x3e0] sm:$0xff] }
  0x36   : > { %736 = vmatmul.f32.gmra.mxu1 %v203_v46  ;;  %2416 = vmatpush.msrb.mxu3 %v2571_v13  ;;  %v340_v13 = vld [vmem:[%s2566_s22 + $0x468] sm:$0xff]  ;;  %v247_v45 = vld [vmem:[%s2566_s22 + $0x180] sm:$0xff] }
  0x37   : > { %2346 = vmatmul.msk.f32.gmra.mxu2 %vm389_vm1, %v213_v47  ;;  %v248_v47 = vld [vmem:[%s2566_s22 + $0x188] sm:$0xff] }
  0x38   : > { %2417 = vmatpush.msrb.mxu3 %v2587_v17  ;;  %v343_v17 = vld [vmem:[%s2566_s22 + $0x480] sm:$0xff] }
  0x3a   : > { %2418 = vmatpush.msrb.mxu3 %v2598_v19  ;;  %v240_v19 = vld [vmem:[%s2566_s22 + $0x148] sm:$0xff] }
  0x3c   : > { %2419 = vmatpush.msrb.mxu3 %v2607_v21  ;;  %v346_v21 = vld [vmem:[%s2566_s22 + $0x498] sm:$0xff] }
  0x3d   : > { %569 = vmatmul.f32.gmra.mxu0 %v205_v48  ;;  %683 = vmatmul.f32.gmra.mxu3 %v319_v49  ;;  %v258_v49 = vld [vmem:[%s2566_s22 + $0x1d8] sm:$0xff] }
  0x3e   : > { %739 = vmatmul.f32.gmra.mxu1 %v206_v50  ;;  %2420 = vmatpush.msrb.mxu3 %v2616_v23  ;;  %v243_v23 = vld [vmem:[%s2566_s22 + $0x160] sm:$0xff] }
  0x3f   : > { %2347 = vmatmul.msk.f32.gmra.mxu2 %vm389_vm1, %v216_v51  ;;  %v2784_v51 = vld [vmem:[%s4093_s2 + $0x1] ss:$0 sm:$0xff] }
  0x40   : > { %2421 = vmatpush.msrb.mxu3 %v2626_v26  ;;  %v236_v26 = vld [vmem:[%s2566_s22 + $0x128] sm:$0xff] }
  0x42   : > { %2422 = vmatpush.msrb.mxu3 %v2636_v28  ;;  %v238_v28 = vld [vmem:[%s2566_s22 + $0x138] sm:$0xff] }
  0x44   : > { %2423 = vmatpush.msrb.mxu3 %v2645_v30  ;;  %v239_v30 = vld [vmem:[%s2566_s22 + $0x140] sm:$0xff] }
  0x45   : > { %572 = vmatmul.f32.gmra.mxu0 %v208_v52  ;;  %686 = vmatmul.f32.gmra.mxu3 %v322_v53  ;;  %v2789_v52 = vld [vmem:[%s4093_s2] ss:$0 sm:$0xff] }
  0x46   : > { %742 = vmatmul.f32.gmra.mxu1 %v209_v54  ;;  %2424 = vmatpush.msrb.mxu3 %v2654_v32 }
  0x47   : > { %2348 = vmatmul.msk.f32.gmra.mxu2 %vm389_vm1, %v219_v55 }
  0x48   : > { %2425 = vmatpush.msrb.mxu3 %v370_v35  ;;  %v242_v35 = vld [vmem:[%s2566_s22 + $0x158] sm:$0xff] }
  0x4a   : > { %2426 = vmatpush.msrb.mxu3 %v369_v37 }
  0x4c   : > { %2427 = vmatpush.msrb.mxu3 %v368_v39  ;;  %v244_v39 = vld [vmem:[%s2566_s22 + $0x168] sm:$0xff] }
  0x4d   : > { %575 = vmatmul.f32.gmra.mxu0 %v211_v56  ;;  %689 = vmatmul.f32.gmra.mxu3 %v325_v57 }
  0x4e   : > { %745 = vmatmul.f32.gmra.mxu1 %v212_v58  ;;  %2428 = vmatpush.msk.msra.mxu3 %vm543_vm0, %v2509_v2  ;;  %v218_v2 = vld [vmem:[%s2566_s22 + $0x98] sm:$0xff]  ;;  %vm4099_vm0 = vcmask 1046534  }
  0x4f   : > { %2349 = vmatmul.msk.f32.gmra.mxu2 %vm389_vm1, %v222_v59 }
  0x50   : > { %2429 = vmatpush.msra.mxu3 %v2522_v5  ;;  %v334_v5 = vld [vmem:[%s2566_s22 + $0x438] sm:$0xff] }
  0x52   : > { %2430 = vmatpush.msra.mxu3 %v2540_v8  ;;  %v223_v8 = vld [vmem:[%s2566_s22 + $0xc0] sm:$0xff] }
  0x54   : > { %2431 = vmatpush.msra.mxu3 %v2556_v11  ;;  %v234_v11 = vld [vmem:[%s2566_s22 + $0x118] sm:$0xff] }
  0x55   : > { %578 = vmatmul.f32.gmra.mxu0 %v214_v60  ;;  %692 = vmatmul.f32.gmra.mxu3 %v328_v61  ;;  %v326_v60 = vld [vmem:[%s2566_s22 + $0x3f8] sm:$0xff] }
  0x56   : > { %748 = vmatmul.f32.gmra.mxu1 %v215_v62  ;;  %2432 = vmatpush.msra.mxu3 %v2576_v14  ;;  %v227_v14 = vld [vmem:[%s2566_s22 + $0xe0] sm:$0xff]  ;;  %v250_v61 = vld [vmem:[%s2566_s22 + $0x198] sm:$0xff] }
  0x57   : > { %2350 = vmatmul.msk.f32.gmra.mxu2 %vm389_vm1, %v225_v63 }
  0x5d   : > { %581 = vmatmul.f32.gmra.mxu0 %v217_v0  ;;  %695 = vmatmul.f32.gmra.mxu3 %v331_v1  ;;  %v261_v1 = vld [vmem:[%s2566_s22 + $0x1f0] sm:$0xff] }
  0x5e   : > { %751 = vmatmul.f32.gmra.mxu1 %v218_v2  ;;  %v251_v2 = vld [vmem:[%s2566_s22 + $0x1a0] sm:$0xff] }
  0x5f   : > { %2351 = vmatmul.msk.f32.gmra.mxu2 %vm389_vm1, %v228_v3 }
  0x65   : > { %584 = vmatmul.f32.gmra.mxu0 %v220_v4  ;;  %698 = vmatmul.f32.gmra.mxu3 %v334_v5 }
  0x66   : > { %754 = vmatmul.f32.gmra.mxu1 %v221_v6 }
  0x67   : > { %2352 = vmatmul.msk.f32.gmra.mxu2 %vm389_vm1, %v231_v7 }
  0x6d   : > { %587 = vmatmul.f32.gmra.mxu0 %v223_v8  ;;  %701 = vmatmul.f32.gmra.mxu3 %v337_v9 }
  0x6e   : > { %757 = vmatmul.f32.gmra.mxu1 %v224_v10  ;;  %v329_v10 = vld [vmem:[%s2566_s22 + $0x410] sm:$0xff] }
  0x6f   : > { %2353 = vmatmul.msk.f32.gmra.mxu2 %vm389_vm1, %v234_v11  ;;  %v253_v11 = vld [vmem:[%s2566_s22 + $0x1b0] sm:$0xff] }
  0x75   : > { %590 = vmatmul.f32.gmra.mxu0 %v226_v12  ;;  %704 = vmatmul.f32.gmra.mxu3 %v340_v13 }
  0x76   : > { %760 = vmatmul.f32.gmra.mxu1 %v227_v14  ;;  %v264_v14 = vld [vmem:[%s2566_s22 + $0x208] sm:$0xff] }
  0x77   : > { %2354 = vmatmul.msk.f32.gmra.mxu2 %vm389_vm1, %v237_v15  ;;  %v254_v15 = vld [vmem:[%s2566_s22 + $0x1b8] sm:$0xff] }
  0x7d   : > { %593 = vmatmul.f32.gmra.mxu0 %v229_v16  ;;  %707 = vmatmul.f32.gmra.mxu3 %v343_v17 }
  0x7e   : > { %763 = vmatmul.f32.gmra.mxu1 %v230_v18 }
  0x7f   : > { %2355 = vmatmul.msk.f32.gmra.mxu2 %vm389_vm1, %v240_v19 }
  0x85   : > { %596 = vmatmul.f32.gmra.mxu0 %v232_v20  ;;  %710 = vmatmul.f32.gmra.mxu3 %v346_v21 }
  0x86   : > { %766 = vmatmul.f32.gmra.mxu1 %v233_v22 }
  0x87   : > { %2356 = vmatmul.msk.f32.gmra.mxu2 %vm389_vm1, %v243_v23 }
  0x8d   : > { %599 = vmatmul.f32.gmra.mxu0 %v235_v24  ;;  %713 = vmatmul.f32.gmra.mxu3 %v349_v25  ;;  %v332_v24 = vld [vmem:[%s2566_s22 + $0x428] sm:$0xff] }
  0x8e   : > { %769 = vmatmul.f32.gmra.mxu1 %v236_v26  ;;  %v256_v25 = vld [vmem:[%s2566_s22 + $0x1c8] sm:$0xff] }
  0x8f   : > { %2357 = vmatmul.msk.f32.gmra.mxu2 %vm389_vm1, %v246_v27 }
  0x95   : > { %602 = vmatmul.f32.gmra.mxu0 %v238_v28  ;;  %847 = vmatmul.f32.vlgmr.msrb.gmra.mxu3 %v314_v29  ;;  %v267_v29 = vld [vmem:[%s2566_s22 + $0x220] sm:$0xff] }
  0x96   : > { %772 = vmatmul.f32.gmra.mxu1 %v239_v30  ;;  %v257_v30 = vld [vmem:[%s2566_s22 + $0x1d0] sm:$0xff] }
  0x97   : > { %2358 = vmatmul.msk.f32.gmra.mxu2 %vm389_vm1, %v249_v31 }
  0x9a   : > { %v904_v32 = vpop.f32.mrf.mxu2 }
  0x9d   : > { %850 = vmatmul.f32.gmra.mxu3 %v317_v33  ;;  %605 = vmatmul.f32.gmra.mxu0 %v241_v34 }
  0x9e   : > { %775 = vmatmul.f32.gmra.mxu1 %v242_v35 }
  0x9f   : > { %2359 = vmatmul.msk.f32.gmra.mxu2 %vm389_vm1, %v252_v36 }
  0xa2   : > { %v907_v37 = vpop.f32.mrf.mxu2 }
  0xa5   : > { %853 = vmatmul.f32.gmra.mxu3 %v320_v38  ;;  %608 = vmatmul.f32.gmra.mxu0 %v244_v39  ;;  %v335_v39 = vld [vmem:[%s2566_s22 + $0x440] sm:$0xff] }
  0xa6   : > { %778 = vmatmul.f32.gmra.mxu1 %v245_v40  ;;  %v2831_v40 = vld [vmem:[%s4093_s2 + $0x2] ss:$0 sm:$0xff] }
  0xa7   : > { %2360 = vmatmul.msk.f32.gmra.mxu2 %vm389_vm1, %v255_v41  ;;  %v259_v41 = vld [vmem:[%s2566_s22 + $0x1e0] sm:$0xff] }
  0xaa   : > { %v564_v42 = vpop.f32.mrf.mxu0  ;;  %v910_v43 = vpop.f32.mrf.mxu2 }
  0xab   : > { %v734_v46 = vpop.f32.mrf.mxu1 }
  0xac   : > { %v735_v48 = vadd.f32 %v734_v46, %v564_v42  ;;  %v2840_v46 = vld [vmem:[%s4093_s2 + $0x3] ss:$0 sm:$0xff] }
  0xad   : > { %856 = vmatmul.f32.gmra.mxu3 %v323_v44  ;;  %611 = vmatmul.f32.gmra.mxu0 %v247_v45  ;;  %v270_v45 = vld [vmem:[%s2566_s22 + $0x238] sm:$0xff] }
  0xae   : > { %v905_v50 = vadd.f32 %v904_v32, %v735_v48  ;;  %781 = vmatmul.f32.gmra.mxu1 %v248_v47  ;;  %v260_v47 = vld [vmem:[%s2566_s22 + $0x1e8] sm:$0xff] }
  0xaf   : > { %2361 = vmatmul.msk.f32.gmra.mxu2 %vm389_vm1, %v258_v49 }
  0xb0   : > { %v2792_v53 = vpop.f32.mrf.mxu3  ;;  %v1057_v54 = vmax.f32 %v905_v50, 0.0 }
  0xb1   : > { %4100 = vst [vmem:[#allocation3_spill] sm:$0xff] %v2792_v53 }
  0xb2   : > { %v567_v55 = vpop.f32.mrf.mxu0  ;;  %v913_v56 = vpop.f32.mrf.mxu2  ;;  %v1241_v57 = vmul.f32 %v2784_v51, %v1057_v54  ;;  %v1110_v58 = vmul.f32 %v2789_v52, %v1057_v54 }
  0xb3   : > { %v737_v59 = vpop.f32.mrf.mxu1 }
  0xb4   : > { %v738_v62 = vadd.f32 %v737_v59, %v567_v55  ;;  %v1290_v63 = vsel %vm1289_vm2, %v1241_v57, 0.0  ;;  %v1143_v0 = vsel %vm1142_vm3, %v1110_v58, 0.0 }
  0xb5   : > { %1291 = vadd.xlane.f32.xlu2 %v1290_v63  ;;  %1144 = vadd.xlane.f32.xlu0 %v1143_v0 }
  0xb6   : > { %v908_v3 = vadd.f32 %v907_v37, %v738_v62  ;;  %859 = vmatmul.f32.gmra.mxu3 %v326_v60  ;;  %614 = vmatmul.f32.gmra.mxu0 %v250_v61  ;;  %v338_v60 = vld [vmem:[%s2566_s22 + $0x458] sm:$0xff] }
  0xb7   : > { %2362 = vmatmul.msk.f32.gmra.mxu2 %vm389_vm1, %v261_v1  ;;  %784 = vmatmul.f32.gmra.mxu1 %v251_v2  ;;  %v273_v1 = vld [vmem:[%s2566_s22 + $0x250] sm:$0xff]  ;;  %v262_v2 = vld [vmem:[%s2566_s22 + $0x1f8] sm:$0xff] }
  0xb8   : > { %v1058_v4 = vmax.f32 %v908_v3, 0.0  ;;  %v2803_v5 = vpop.f32.mrf.mxu3  ;;  %v263_v3 = vld [vmem:[%s2566_s22 + $0x200] sm:$0xff] }
  0xb9   : > { %4101 = vst [vmem:[#allocation4_spill] sm:$0xff] %v2803_v5 }
  0xba   : > { %v570_v6 = vpop.f32.mrf.mxu0  ;;  %v916_v7 = vpop.f32.mrf.mxu2  ;;  %v1111_v8 = vmul.f32 %v2789_v52, %v1058_v4  ;;  %v1242_v18 = vmul.f32 %v2784_v51, %v1058_v4 }
  0xbb   : > { %v740_v9 = vpop.f32.mrf.mxu1 }
  0xbc   : > { %v741_v12 = vadd.f32 %v740_v9, %v570_v6  ;;  %v1146_v13 = vsel %vm1142_vm3, %v1111_v8, 0.0  ;;  %v1293_v27 = vsel %vm1142_vm3, %v1242_v18, 0.0 }
  0xbd   : > { %1147 = vadd.xlane.f32.xlu0 %v1146_v13  ;;  %v341_v13 = vld [vmem:[%s2566_s22 + $0x470] sm:$0xff] }
  0xbe   : > { %v911_v16 = vadd.f32 %v910_v43, %v741_v12  ;;  %862 = vmatmul.f32.gmra.mxu3 %v329_v10  ;;  %617 = vmatmul.f32.gmra.mxu0 %v253_v11 }
  0xbf   : > { %2363 = vmatmul.msk.f32.gmra.mxu2 %vm389_vm1, %v264_v14  ;;  %787 = vmatmul.f32.gmra.mxu1 %v254_v15 }
  0xc0   : > { %v2812_v17 = vpop.f32.mrf.mxu3  ;;  %v1059_v19 = vmax.f32 %v911_v16, 0.0 }
  0xc1   : > { %4102 = vst [vmem:[#allocation5_spill] sm:$0xff] %v2812_v17 }
  0xc2   : > { %v573_v20 = vpop.f32.mrf.mxu0  ;;  %v919_v21 = vpop.f32.mrf.mxu2  ;;  %v1243_v22 = vmul.f32 %v2784_v51, %v1059_v19  ;;  %v276_v19 = vld [vmem:[%s2566_s22 + $0x268] sm:$0xff] }
  0xc3   : > { %v743_v23 = vpop.f32.mrf.mxu1 }
  0xc4   : > { %v744_v26 = vadd.f32 %v743_v23, %v573_v20  ;;  %v1297_v28 = vsel %vm1296_vm4, %v1243_v22, 0.0  ;;  %v265_v20 = vld [vmem:[%s2566_s22 + $0x210] sm:$0xff]  ;;  %v266_v22 = vld [vmem:[%s2566_s22 + $0x218] sm:$0xff] }
  0xc5   : > { %1294 = vadd.xlane.f32.xlu0 %v1293_v27  ;;  %1298 = vadd.xlane.f32.xlu1 %v1297_v28 }
  0xc6   : > { %v914_v31 = vadd.f32 %v913_v56, %v744_v26  ;;  %865 = vmatmul.f32.gmra.mxu3 %v332_v24  ;;  %620 = vmatmul.f32.gmra.mxu0 %v256_v25 }
  0xc7   : > { %2364 = vmatmul.msk.f32.gmra.mxu2 %vm389_vm1, %v267_v29  ;;  %790 = vmatmul.f32.gmra.mxu1 %v257_v30 }
  0xc8   : > { %v1060_v32 = vmax.f32 %v914_v31, 0.0  ;;  %v2823_v33 = vpop.f32.mrf.mxu3 }
  0xca   : > { %v576_v34 = vpop.f32.mrf.mxu0  ;;  %v922_v35 = vpop.f32.mrf.mxu2  ;;  %v1244_v36 = vmul.f32 %v2784_v51, %v1060_v32  ;;  %v1112_v37 = vmul.f32 %v2789_v52, %v1060_v32  ;;  %v1437_v54 = vmul.f32 %v2831_v40, %v1060_v32  ;;  %v1567_v55 = vmul.f32 %v2840_v46, %v1060_v32  ;;  %v344_v32 = vld [vmem:[%s2566_s22 + $0x488] sm:$0xff] }
  0xcb   : > { %v746_v38 = vpop.f32.mrf.mxu1 }
  0xcc   : > { %v747_v42 = vadd.f32 %v746_v38, %v576_v34  ;;  %v1300_v43 = vsel %vm1289_vm2, %v1244_v36, 0.0  ;;  %v1149_v44 = vsel %vm1142_vm3, %v1112_v37, 0.0  ;;  %v1469_v62 = vsel %vm1142_vm3, %v1437_v54, 0.0  ;;  %v279_v37 = vld [vmem:[%s2566_s22 + $0x280] sm:$0xff]  ;;  %v268_v38 = vld [vmem:[%s2566_s22 + $0x228] sm:$0xff] }
  0xcd   : > { %1301 = vadd.xlane.f32.xlu2 %v1300_v43  ;;  %1150 = vadd.xlane.f32.xlu1 %v1149_v44  ;;  %v1615_v63 = vsel %vm1289_vm2, %v1567_v55, 0.0 }
  0xce   : > { %v917_v48 = vadd.f32 %v916_v7, %v747_v42  ;;  %868 = vmatmul.f32.gmra.mxu3 %v335_v39  ;;  %623 = vmatmul.f32.gmra.mxu0 %v259_v41  ;;  %v269_v41 = vld [vmem:[%s2566_s22 + $0x230] sm:$0xff] }
  0xcf   : > { %2365 = vmatmul.msk.f32.gmra.mxu2 %vm389_vm1, %v270_v45  ;;  %793 = vmatmul.f32.gmra.mxu1 %v260_v47 }
  0xd0   : > { %v1061_v49 = vmax.f32 %v917_v48, 0.0  ;;  %v2844_v50 = vpop.f32.mrf.mxu3 }
  0xd2   : > { %v579_v56 = vpop.f32.mrf.mxu0  ;;  %v925_v57 = vpop.f32.mrf.mxu2  ;;  %v1245_v58 = vmul.f32 %v2784_v51, %v1061_v49  ;;  %v1568_v7 = vmul.f32 %v2840_v46, %v1061_v49  ;;  %v1113_v8 = vmul.f32 %v2789_v52, %v1061_v49  ;;  %v1438_v9 = vmul.f32 %v2831_v40, %v1061_v49 }
  0xd3   : > { %v749_v59 = vpop.f32.mrf.mxu1 }
  0xd4   : > { %v750_v61 = vadd.f32 %v749_v59, %v579_v56  ;;  %v1303_v0 = vsel %vm1142_vm3, %v1245_v58, 0.0  ;;  %v1618_v16 = vsel %vm1142_vm3, %v1568_v7, 0.0  ;;  %v1152_v18 = vsel %vm1142_vm3, %v1113_v8, 0.0  ;;  %v347_v56 = vld [vmem:[%s2566_s22 + $0x4a0] sm:$0xff] }
  0xd5   : > { %1470 = vadd.xlane.f32.xlu2 %v1469_v62  ;;  %1616 = vadd.xlane.f32.xlu1 %v1615_v63  ;;  %v271_v62 = vld [vmem:[%s2566_s22 + $0x240] sm:$0xff]  ;;  %v272_v63 = vld [vmem:[%s2566_s22 + $0x248] sm:$0xff] }
  0xd6   : > { %1304 = vadd.xlane.f32.xlu0 %v1303_v0  ;;  %871 = vmatmul.f32.gmra.mxu3 %v338_v60  ;;  %v920_v4 = vadd.f32 %v919_v21, %v750_v61  ;;  %v1472_v21 = vsel %vm1142_vm3, %v1438_v9, 0.0  ;;  %v282_v61 = vld [vmem:[%s2566_s22 + $0x298] sm:$0xff] }
  0xd7   : > { %2366 = vmatmul.msk.f32.gmra.mxu2 %vm389_vm1, %v273_v1  ;;  %626 = vmatmul.f32.gmra.mxu0 %v262_v2 }
  0xd8   : > { %v2857_v6 = vpop.f32.mrf.mxu3  ;;  %796 = vmatmul.f32.gmra.mxu1 %v263_v3  ;;  %v1062_v14 = vmax.f32 %v920_v4, 0.0 }
  0xda   : > { %v582_v10 = vpop.f32.mrf.mxu0  ;;  %v928_v11 = vpop.f32.mrf.mxu2  ;;  %v1246_v26 = vmul.f32 %v2784_v51, %v1062_v14  ;;  %v1569_v27 = vmul.f32 %v2840_v46, %v1062_v14 }
  0xdb   : > { %v752_v12 = vpop.f32.mrf.mxu1 }
  0xdc   : > { %v753_v15 = vadd.f32 %v752_v12, %v582_v10  ;;  %v1621_v39 = vsel %vm1296_vm4, %v1569_v27, 0.0 }
  0xdd   : > { %1619 = vadd.xlane.f32.xlu2 %v1618_v16  ;;  %1153 = vadd.xlane.f32.xlu1 %v1152_v18  ;;  %v285_v16 = vld [vmem:[%s2566_s22 + $0x2b0] sm:$0xff]  ;;  %v274_v18 = vld [vmem:[%s2566_s22 + $0x258] sm:$0xff] }
  0xde   : > { %v923_v23 = vadd.f32 %v922_v35, %v753_v15  ;;  %1473 = vadd.xlane.f32.xlu0 %v1472_v21  ;;  %874 = vmatmul.f32.gmra.mxu3 %v341_v13  ;;  %v1306_v35 = vsel %vm1296_vm4, %v1246_v26, 0.0 }
  0xdf   : > { %2367 = vmatmul.msk.f32.gmra.mxu2 %vm389_vm1, %v276_v19  ;;  %629 = vmatmul.f32.gmra.mxu0 %v265_v20  ;;  %v275_v19 = vld [vmem:[%s2566_s22 + $0x260] sm:$0xff] }
  0xe0   : > { %v1063_v24 = vmax.f32 %v923_v23, 0.0  ;;  %v2870_v25 = vpop.f32.mrf.mxu3  ;;  %799 = vmatmul.f32.gmra.mxu1 %v266_v22 }
  0xe2   : > { %v585_v28 = vpop.f32.mrf.mxu0  ;;  %v931_v29 = vpop.f32.mrf.mxu2  ;;  %v1114_v30 = vmul.f32 %v2789_v52, %v1063_v24  ;;  %v1439_v45 = vmul.f32 %v2831_v40, %v1063_v24  ;;  %v1247_v47 = vmul.f32 %v2784_v51, %v1063_v24  ;;  %v1570_v3 = vmul.f32 %v2840_v46, %v1063_v24 }
  0xe3   : > { %v755_v31 = vpop.f32.mrf.mxu1 }
  0xe4   : > { %v756_v34 = vadd.f32 %v755_v31, %v585_v28  ;;  %v1155_v36 = vsel %vm1142_vm3, %v1114_v30, 0.0  ;;  %v1475_v58 = vsel %vm1142_vm3, %v1439_v45, 0.0  ;;  %v1309_v59 = vsel %vm1289_vm2, %v1247_v47, 0.0  ;;  %v324_v30 = vld [vmem:[%s2566_s22 + $0x3e8] sm:$0xff] }
  0xe5   : > { %1307 = vadd.xlane.f32.xlu1 %v1306_v35  ;;  %1156 = vadd.xlane.f32.xlu2 %v1155_v36  ;;  %v1624_v13 = vsel %vm1289_vm2, %v1570_v3, 0.0  ;;  %v288_v36 = vld [vmem:[%s2566_s22 + $0x2c8] sm:$0xff] }
  0xe6   : > { %v926_v42 = vadd.f32 %v925_v57, %v756_v34  ;;  %1622 = vadd.xlane.f32.xlu0 %v1621_v39  ;;  %877 = vmatmul.f32.gmra.mxu3 %v344_v32 }
  0xe7   : > { %2368 = vmatmul.msk.f32.gmra.mxu2 %vm389_vm1, %v279_v37  ;;  %632 = vmatmul.f32.gmra.mxu0 %v268_v38  ;;  %v277_v37 = vld [vmem:[%s2566_s22 + $0x270] sm:$0xff]  ;;  %v278_v38 = vld [vmem:[%s2566_s22 + $0x278] sm:$0xff] }
  0xe8   : > { %v2883_v43 = vmax.f32 %v926_v42, 0.0  ;;  %v2885_v44 = vpop.f32.mrf.mxu3  ;;  %802 = vmatmul.f32.gmra.mxu1 %v269_v41 }
  0xea   : > { %v588_v48 = vpop.f32.mrf.mxu0  ;;  %v2889_v49 = vpop.f32.mrf.mxu2  ;;  %v1248_v54 = vmul.f32 %v2784_v51, %v2883_v43  ;;  %v1115_v4 = vmul.f32 %v2789_v52, %v2883_v43  ;;  %v1440_v23 = vmul.f32 %v2831_v40, %v2883_v43  ;;  %v1571_v42 = vmul.f32 %v2840_v46, %v2883_v43 }
  0xeb   : > { %v758_v55 = vpop.f32.mrf.mxu1 }
  0xec   : > { %v759_v57 = vadd.f32 %v758_v55, %v588_v48  ;;  %v1312_v60 = vsel %vm1142_vm3, %v1248_v54, 0.0  ;;  %v1158_v14 = vsel %vm1142_vm3, %v1115_v4, 0.0  ;;  %v1478_v32 = vsel %vm1142_vm3, %v1440_v23, 0.0 }
  0xed   : > { %1476 = vadd.xlane.f32.xlu1 %v1475_v58  ;;  %1310 = vadd.xlane.f32.xlu2 %v1309_v59  ;;  %v1627_v58 = vsel %vm1142_vm3, %v1571_v42, 0.0  ;;  %v291_v59 = vld [vmem:[%s2566_s22 + $0x2e0] sm:$0xff] }
  0xee   : > { %v929_v0 = vadd.f32 %v928_v11, %v759_v57  ;;  %1313 = vadd.xlane.f32.xlu0 %v1312_v60  ;;  %880 = vmatmul.f32.gmra.mxu3 %v347_v56  ;;  %v350_v11 = vld [vmem:[%s2566_s22 + $0x4b8] sm:$0xff]  ;;  %v327_v56 = vld [vmem:[%s2566_s22 + $0x400] sm:$0xff]  ;;  %v280_v60 = vld [vmem:[%s2566_s22 + $0x288] sm:$0xff] }
  0xef   : > { %2369 = vmatmul.msk.f32.gmra.mxu2 %vm389_vm1, %v282_v61  ;;  %635 = vmatmul.f32.gmra.mxu0 %v271_v62  ;;  %v281_v62 = vld [vmem:[%s2566_s22 + $0x290] sm:$0xff] }
  0xf0   : > { %v1065_v1 = vmax.f32 %v929_v0, 0.0  ;;  %v2901_v2 = vpop.f32.mrf.mxu3  ;;  %805 = vmatmul.f32.gmra.mxu1 %v272_v63 }
  0xf2   : > { %v591_v7 = vpop.f32.mrf.mxu0  ;;  %v2906_v8 = vpop.f32.mrf.mxu2  ;;  %v1572_v9 = vmul.f32 %v2840_v46, %v1065_v1  ;;  %v1249_v24 = vmul.f32 %v2784_v51, %v1065_v1 }
  0xf3   : > { %v761_v10 = vpop.f32.mrf.mxu1 }
  0xf4   : > { %v762_v12 = vadd.f32 %v761_v10, %v591_v7  ;;  %v1630_v15 = vsel %vm1296_vm4, %v1572_v9, 0.0  ;;  %v1315_v34 = vsel %vm1296_vm4, %v1249_v24, 0.0 }
  0xf5   : > { %1625 = vadd.xlane.f32.xlu1 %v1624_v13  ;;  %1159 = vadd.xlane.f32.xlu2 %v1158_v14 }
  0xf6   : > { %v932_v20 = vadd.f32 %v931_v29, %v762_v12  ;;  %1631 = vadd.xlane.f32.xlu0 %v1630_v15  ;;  %883 = vmatmul.f32.gmra.mxu3 %v350_v11  ;;  %v330_v11 = vld [vmem:[%s2566_s22 + $0x418] sm:$0xff] }
  0xf7   : > { %2370 = vmatmul.msk.f32.gmra.mxu2 %vm389_vm1, %v285_v16  ;;  %638 = vmatmul.f32.gmra.mxu0 %v274_v18  ;;  %v294_v15 = vld [vmem:[%s2566_s22 + $0x2f8] sm:$0xff] }
  0xf8   : > { %v1066_v21 = vmax.f32 %v932_v20, 0.0  ;;  %v2917_v22 = vpop.f32.mrf.mxu3  ;;  %808 = vmatmul.f32.gmra.mxu1 %v275_v19  ;;  %v284_v19 = vld [vmem:[%s2566_s22 + $0x2a8] sm:$0xff] }
  0xfa   : > { %v594_v26 = vpop.f32.mrf.mxu0  ;;  %v2922_v27 = vpop.f32.mrf.mxu2  ;;  %v1116_v28 = vmul.f32 %v2789_v52, %v1066_v21  ;;  %v1573_v45 = vmul.f32 %v2840_v46, %v1066_v21  ;;  %v1441_v47 = vmul.f32 %v2831_v40, %v1066_v21  ;;  %v1250_v0 = vmul.f32 %v2784_v51, %v1066_v21 }
  0xfb   : > { %v764_v29 = vpop.f32.mrf.mxu1 }
  0xfc   : > { %v765_v31 = vadd.f32 %v764_v29, %v594_v26  ;;  %v1161_v35 = vsel %vm1142_vm3, %v1116_v28, 0.0  ;;  %v1481_v43 = vsel %vm1142_vm3, %v1441_v47, 0.0  ;;  %v1318_v13 = vsel %vm1289_vm2, %v1250_v0, 0.0 }
  0xfd   : > { %1479 = vadd.xlane.f32.xlu2 %v1478_v32  ;;  %1316 = vadd.xlane.f32.xlu1 %v1315_v34 }
  0xfe   : > { %1162 = vadd.xlane.f32.xlu0 %v1161_v35  ;;  %2383 = vmatmul.msk.f32.vlgmr.msra.gmra.mxu3 %vm389_vm1, %v324_v30  ;;  %v935_v39 = vadd.f32 %v2889_v49, %v765_v31  ;;  %v1633_v49 = vsel %vm1289_vm2, %v1573_v45, 0.0  ;;  %v333_v30 = vld [vmem:[%s2566_s22 + $0x430] sm:$0xff] }
  0xff   : > { %2371 = vmatmul.msk.f32.gmra.mxu2 %vm389_vm1, %v288_v36  ;;  %641 = vmatmul.f32.gmra.mxu0 %v277_v37 }
 0x100   : > { %v2935_v41 = vpop.f32.mrf.mxu3  ;;  %811 = vmatmul.f32.gmra.mxu1 %v278_v38  ;;  %v1067_v57 = vmax.f32 %v935_v39, 0.0 }
 0x102   : > { %v597_v48 = vpop.f32.mrf.mxu0  ;;  %v943_v54 = vpop.f32.mrf.mxu2  ;;  %v1117_v1 = vmul.f32 %v2789_v52, %v1067_v57  ;;  %v1251_v4 = vmul.f32 %v2784_v51, %v1067_v57  ;;  %v1574_v23 = vmul.f32 %v2840_v46, %v1067_v57  ;;  %v1442_v24 = vmul.f32 %v2831_v40, %v1067_v57 }
 0x103   : > { %v767_v55 = vpop.f32.mrf.mxu1 }
 0x104   : > { %v768_v61 = vadd.f32 %v767_v55, %v597_v48  ;;  %v1164_v14 = vsel %vm1142_vm3, %v1117_v1, 0.0  ;;  %v1321_v18 = vsel %vm1142_vm3, %v1251_v4, 0.0  ;;  %v1636_v34 = vsel %vm1142_vm3, %v1574_v23, 0.0 }
 0x105   : > { %1628 = vadd.xlane.f32.xlu2 %v1627_v58  ;;  %1634 = vadd.xlane.f32.xlu1 %v1633_v49  ;;  %v1484_v35 = vsel %vm1142_vm3, %v1442_v24, 0.0 }
 0x106   : > { %1482 = vadd.xlane.f32.xlu0 %v1481_v43  ;;  %2384 = vmatmul.msk.f32.gmra.mxu3 %vm389_vm1, %v327_v56  ;;  %v938_v3 = vadd.f32 %v2906_v8, %v768_v61  ;;  %v283_v8 = vld [vmem:[%s2566_s22 + $0x2a0] sm:$0xff]  ;;  %v286_v43 = vld [vmem:[%s2566_s22 + $0x2b8] sm:$0xff] }
 0x107   : > { %2372 = vmatmul.msk.f32.gmra.mxu2 %vm389_vm1, %v291_v59  ;;  %644 = vmatmul.f32.gmra.mxu0 %v280_v60  ;;  %v300_v59 = vld [vmem:[%s2566_s22 + $0x328] sm:$0xff] }
 0x108   : > { %v2950_v63 = vpop.f32.mrf.mxu3  ;;  %814 = vmatmul.f32.gmra.mxu1 %v281_v62  ;;  %v1068_v16 = vmax.f32 %v938_v3, 0.0  ;;  %v287_v62 = vld [vmem:[%s2566_s22 + $0x2c0] sm:$0xff] }
 0x109   : > { %4103 = vst [vmem:[#allocation6_spill] sm:$0xff] %v2950_v63 }
 0x10a   : > { %v600_v7 = vpop.f32.mrf.mxu0  ;;  %v946_v10 = vpop.f32.mrf.mxu2  ;;  %v1575_v26 = vmul.f32 %v2840_v46, %v1068_v16  ;;  %v1252_v45 = vmul.f32 %v2784_v51, %v1068_v16 }
 0x10b   : > { %v770_v9 = vpop.f32.mrf.mxu1 }
 0x10c   : > { %v771_v12 = vadd.f32 %v770_v9, %v600_v7  ;;  %v1639_v37 = vsel %vm1296_vm4, %v1575_v26, 0.0  ;;  %v1324_v57 = vsel %vm1296_vm4, %v1252_v45, 0.0 }
 0x10d   : > { %1319 = vadd.xlane.f32.xlu2 %v1318_v13  ;;  %1165 = vadd.xlane.f32.xlu1 %v1164_v14 }
 0x10e   : > { %1322 = vadd.xlane.f32.xlu0 %v1321_v18  ;;  %2385 = vmatmul.msk.f32.gmra.mxu3 %vm389_vm1, %v330_v11  ;;  %v941_v20 = vadd.f32 %v2922_v27, %v771_v12  ;;  %v297_v27 = vld [vmem:[%s2566_s22 + $0x310] sm:$0xff] }
 0x10f   : > { %2373 = vmatmul.msk.f32.gmra.mxu2 %vm389_vm1, %v294_v15  ;;  %647 = vmatmul.f32.gmra.mxu0 %v283_v8  ;;  %v303_v15 = vld [vmem:[%s2566_s22 + $0x340] sm:$0xff] }
 0x110   : > { %v2966_v21 = vpop.f32.mrf.mxu3  ;;  %817 = vmatmul.f32.gmra.mxu1 %v284_v19  ;;  %v1069_v31 = vmax.f32 %v941_v20, 0.0 }
 0x111   : > { %4104 = vst [vmem:[#allocation7_spill] sm:$0xff] %v2966_v21 }
 0x112   : > { %v603_v28 = vpop.f32.mrf.mxu0  ;;  %v949_v36 = vpop.f32.mrf.mxu2  ;;  %v1118_v47 = vmul.f32 %v2789_v52, %v1069_v31  ;;  %v1576_v3 = vmul.f32 %v2840_v46, %v1069_v31  ;;  %v1253_v4 = vmul.f32 %v2784_v51, %v1069_v31  ;;  %v1443_v20 = vmul.f32 %v2831_v40, %v1069_v31 }
 0x113   : > { %v773_v29 = vpop.f32.mrf.mxu1 }
 0x114   : > { %v774_v32 = vadd.f32 %v773_v29, %v603_v28  ;;  %v1167_v58 = vsel %vm1142_vm3, %v1118_v47, 0.0  ;;  %v1642_v13 = vsel %vm1289_vm2, %v1576_v3, 0.0  ;;  %v1327_v14 = vsel %vm1289_vm2, %v1253_v4, 0.0 }
 0x115   : > { %1637 = vadd.xlane.f32.xlu2 %v1636_v34  ;;  %1485 = vadd.xlane.f32.xlu1 %v1484_v35  ;;  %v1487_v35 = vsel %vm1142_vm3, %v1443_v20, 0.0  ;;  %v312_v20 = vld [vmem:[%s2566_s22 + $0x388] sm:$0xff] }
 0x116   : > { %v944_v38 = vadd.f32 %v943_v54, %v774_v32  ;;  %1640 = vadd.xlane.f32.xlu0 %v1639_v37  ;;  %2386 = vmatmul.msk.f32.gmra.mxu3 %vm389_vm1, %v333_v30  ;;  %v336_v54 = vld [vmem:[%s2566_s22 + $0x448] sm:$0xff]  ;;  %v342_v32 = vld [vmem:[%s2566_s22 + $0x478] sm:$0xff] }
 0x117   : > { %2374 = vmatmul.msk.f32.gmra.mxu2 %vm389_vm1, %v297_v27  ;;  %650 = vmatmul.f32.gmra.mxu0 %v286_v43  ;;  %v306_v27 = vld [vmem:[%s2566_s22 + $0x358] sm:$0xff] }
 0x118   : > { %v2978_v39 = vmax.f32 %v944_v38, 0.0  ;;  %v2980_v42 = vpop.f32.mrf.mxu3  ;;  %820 = vmatmul.f32.gmra.mxu1 %v287_v62  ;;  %v289_v62 = vld [vmem:[%s2566_s22 + $0x2d0] sm:$0xff] }
 0x119   : > { %4105 = vst [vmem:[#allocation8_spill] sm:$0xff] %v2980_v42 }
 0x11a   : > { %v1119_v48 = vmul.f32 %v2789_v52, %v2978_v39  ;;  %v606_v55 = vpop.f32.mrf.mxu0  ;;  %v952_v0 = vpop.f32.mrf.mxu2  ;;  %v1254_v7 = vmul.f32 %v2784_v51, %v2978_v39  ;;  %v1444_v26 = vmul.f32 %v2831_v40, %v2978_v39  ;;  %v1577_v47 = vmul.f32 %v2840_v46, %v2978_v39 }
 0x11b   : > { %v776_v56 = vpop.f32.mrf.mxu1 }
 0x11c   : > { %v1170_v49 = vsel %vm1142_vm3, %v1119_v48, 0.0  ;;  %v777_v60 = vadd.f32 %v776_v56, %v606_v55  ;;  %v1330_v18 = vsel %vm1142_vm3, %v1254_v7, 0.0  ;;  %v1490_v31 = vsel %vm1142_vm3, %v1444_v26, 0.0 }
 0x11d   : > { %1325 = vadd.xlane.f32.xlu1 %v1324_v57  ;;  %1168 = vadd.xlane.f32.xlu2 %v1167_v58  ;;  %v345_v58 = vld [vmem:[%s2566_s22 + $0x490] sm:$0xff] }
 0x11e   : > { %1171 = vadd.xlane.f32.xlu0 %v1170_v49  ;;  %2387 = vmatmul.msk.f32.gmra.mxu3 %vm389_vm1, %v336_v54  ;;  %v947_v61 = vadd.f32 %v946_v10, %v777_v60  ;;  %v339_v10 = vld [vmem:[%s2566_s22 + $0x460] sm:$0xff]  ;;  %v309_v60 = vld [vmem:[%s2566_s22 + $0x370] sm:$0xff] }
 0x11f   : > { %2375 = vmatmul.msk.f32.gmra.mxu2 %vm389_vm1, %v300_v59  ;;  %v1645_v59 = vsel %vm1142_vm3, %v1577_v47, 0.0  ;;  %653 = vmatmul.f32.gmra.mxu0 %v289_v62 }
 0x120   : > { %v2995_v1 = vpop.f32.mrf.mxu3  ;;  %v1071_v9 = vmax.f32 %v947_v61, 0.0 }
 0x121   : > { %4106 = vst [vmem:[#allocation9_spill] sm:$0xff] %v2995_v1 }
 0x122   : > { %v609_v11 = vpop.f32.mrf.mxu0  ;;  %v1255_v19 = vmul.f32 %v2784_v51, %v1071_v9  ;;  %v955_v23 = vpop.f32.mrf.mxu2  ;;  %v1578_v55 = vmul.f32 %v2840_v46, %v1071_v9 }
 0x123   : > { %v779_v12 = vpop.f32.mrf.mxu1 }
 0x124   : > { %v780_v16 = vadd.f32 %v779_v12, %v609_v11  ;;  %v1333_v29 = vsel %vm1296_vm4, %v1255_v19, 0.0  ;;  %v1648_v39 = vsel %vm1296_vm4, %v1578_v55, 0.0 }
 0x125   : > { %1643 = vadd.xlane.f32.xlu1 %v1642_v13  ;;  %1328 = vadd.xlane.f32.xlu2 %v1327_v14 }
 0x126   : > { %1331 = vadd.xlane.f32.xlu0 %v1330_v18  ;;  %2388 = vmatmul.msk.f32.gmra.mxu3 %vm389_vm1, %v339_v10  ;;  %v950_v8 = vadd.f32 %v949_v36, %v780_v16  ;;  %v348_v16 = vld [vmem:[%s2566_s22 + $0x4a8] sm:$0xff] }
 0x127   : > { %2376 = vmatmul.msk.f32.gmra.mxu2 %vm389_vm1, %v303_v15 }
 0x128   : > { %v3010_v24 = vpop.f32.mrf.mxu3  ;;  %v3014_v28 = vmax.f32 %v950_v8, 0.0  ;;  %v3020_v37 = vpop.xlane.xlu0 %1144 }
 0x129   : > { %4107 = vst [vmem:[#allocation10_spill] sm:$0xff] %v3010_v24  ;;  %v3047_v9 = vpop.xlane.xlu2 %1291 }
 0x12a   : > { %v612_v30 = vpop.f32.mrf.mxu0  ;;  %v1120_v38 = vmul.f32 %v2789_v52, %v3014_v28  ;;  %v958_v56 = vpop.f32.mrf.mxu2  ;;  %v1256_v10 = vmul.f32 %v2784_v51, %v3014_v28  ;;  %v1445_v12 = vmul.f32 %v2831_v40, %v3014_v28 }
 0x12b   : > { %v782_v34 = vpop.f32.mrf.mxu1 }
 0x12c   : > { %v783_v36 = vadd.f32 %v782_v34, %v612_v30  ;;  %v1173_v54 = vsel %vm1142_vm3, %v1120_v38, 0.0  ;;  %v1336_v8 = vsel %vm1289_vm2, %v1256_v10, 0.0  ;;  %v1493_v19 = vsel %vm1142_vm3, %v1445_v12, 0.0  ;;  %v292_v30 = vld [vmem:[%s2566_s22 + $0x2e8] sm:$0xff] }
 0x12d   : > { %1488 = vadd.xlane.f32.xlu2 %v1487_v35  ;;  %1334 = vadd.xlane.f32.xlu1 %v1333_v29 }
 0x12e   : > { %1491 = vadd.xlane.f32.xlu0 %v1490_v31  ;;  %2389 = vmatmul.msk.f32.gmra.mxu3 %vm389_vm1, %v342_v32  ;;  %v953_v45 = vadd.f32 %v952_v0, %v783_v36  ;;  %v290_v0 = vld [vmem:[%s2566_s22 + $0x2d8] sm:$0xff]  ;;  %v293_v32 = vld [vmem:[%s2566_s22 + $0x2f0] sm:$0xff]  ;;  %v1579_v31 = vmul.f32 %v2840_v46, %v3014_v28 }
 0x12f   : > { %2377 = vmatmul.msk.f32.gmra.mxu2 %vm389_vm1, %v306_v27  ;;  %823 = vmatmul.f32.gmra.mxu1 %v290_v0 }
 0x130   : > { %v3029_v48 = vpop.f32.mrf.mxu3  ;;  %v3033_v57 = vmax.f32 %v953_v45, 0.0  ;;  %v3042_v3 = vpop.xlane.xlu0 %1147  ;;  %656 = vmatmul.f32.gmra.mxu0 %v292_v30 }
 0x132   : > { %v1257_v7 = vmul.f32 %v2784_v51, %v3033_v57  ;;  %v961_v26 = vpop.f32.mrf.mxu2  ;;  %v1121_v38 = vmul.f32 %v2789_v52, %v3033_v57  ;;  %v1446_v0 = vmul.f32 %v2831_v40, %v3033_v57  ;;  %v1580_v30 = vmul.f32 %v2840_v46, %v3033_v57 }
 0x133   : > { %v615_v49 = vpop.f32.mrf.mxu0 }
 0x134   : > { %v785_v61 = vpop.f32.mrf.mxu1  ;;  %v1339_v15 = vsel %vm1142_vm3, %v1257_v7, 0.0 }
 0x135   : > { %1646 = vadd.xlane.f32.xlu2 %v1645_v59  ;;  %1174 = vadd.xlane.f32.xlu1 %v1173_v54  ;;  %v786_v43 = vadd.f32 %v785_v61, %v615_v49  ;;  %v1651_v49 = vsel %vm1289_vm2, %v1579_v31, 0.0  ;;  %v1176_v59 = vsel %vm1142_vm3, %v1121_v38, 0.0 }
 0x136   : > { %1649 = vadd.xlane.f32.xlu0 %v1648_v39  ;;  %2390 = vmatmul.msk.f32.gmra.mxu3 %vm389_vm1, %v345_v58 }
 0x137   : > { %2378 = vmatmul.msk.f32.gmra.mxu2 %vm389_vm1, %v309_v60  ;;  %v956_v4 = vadd.f32 %v955_v23, %v786_v43  ;;  %826 = vmatmul.f32.gmra.mxu1 %v293_v32  ;;  %v315_v60 = vld [vmem:[%s2566_s22 + $0x3a0] sm:$0xff] }
 0x138   : > { %v3049_v11 = vpop.xlane.xlu1 %1298  ;;  %v3075_v45 = vpop.xlane.xlu0 %1294 }
 0x139   : > { %v3055_v13 = vpop.f32.mrf.mxu3  ;;  %v1074_v14 = vmax.f32 %v956_v4, 0.0 }
 0x13a   : > { %v964_v28 = vpop.f32.mrf.mxu2 }
 0x13b   : > { %v618_v18 = vpop.f32.mrf.mxu0  ;;  %v1581_v35 = vmul.f32 %v2840_v46, %v1074_v14  ;;  %v1258_v4 = vmul.f32 %v2784_v51, %v1074_v14 }
 0x13c   : > { %v788_v23 = vpop.f32.mrf.mxu1 }
 0x13d   : > { %1337 = vadd.xlane.f32.xlu2 %v1336_v8  ;;  %1494 = vadd.xlane.f32.xlu1 %v1493_v19  ;;  %v789_v29 = vadd.f32 %v788_v23, %v618_v18  ;;  %v1657_v54 = vsel %vm1296_vm4, %v1581_v35, 0.0  ;;  %v1496_v18 = vsel %vm1142_vm3, %v1446_v0, 0.0  ;;  %v1342_v8 = vsel %vm1296_vm4, %v1258_v4, 0.0  ;;  %v318_v19 = vld [vmem:[%s2566_s22 + $0x3b8] sm:$0xff] }
 0x13e   : > { %1340 = vadd.xlane.f32.xlu0 %v1339_v15  ;;  %2391 = vmatmul.msk.f32.gmra.mxu3 %vm389_vm1, %v348_v16  ;;  %v1791_v0 = vlaneseq }
 0x13f   : > { %2379 = vmatmul.msk.f32.gmra.mxu2 %vm389_vm1, %v312_v20  ;;  %v959_v34 = vadd.f32 %v958_v56, %v789_v29  ;;  %v351_v56 = vld [vmem:[%s2566_s22 + $0x4c0] sm:$0xff] }
 0x140   : > { %v3067_v27 = vpop.xlane.xlu2 %1301  ;;  %v3069_v36 = vpop.xlane.xlu1 %1150 }
 0x141   : > { %v3077_v47 = vpop.f32.mrf.mxu3  ;;  %v1075_v55 = vmax.f32 %v959_v34, 0.0 }
 0x142   : > { %v967_v38 = vpop.f32.mrf.mxu2 }
 0x143   : > { %v621_v58 = vpop.f32.mrf.mxu0  ;;  %v1122_v39 = vmul.f32 %v2789_v52, %v1075_v55  ;;  %v1582_v32 = vmul.f32 %v2840_v46, %v1075_v55  ;;  %v1447_v31 = vmul.f32 %v2831_v40, %v1075_v55 }
 0x144   : > { %v791_v61 = vpop.f32.mrf.mxu1 }
 0x145   : > { %1652 = vadd.xlane.f32.xlu1 %v1651_v49  ;;  %1177 = vadd.xlane.f32.xlu2 %v1176_v59  ;;  %v1179_v12 = vsel %vm1142_vm3, %v1122_v39, 0.0  ;;  %v792_v16 = vadd.f32 %v791_v61, %v621_v58  ;;  %v321_v58 = vld [vmem:[%s2566_s22 + $0x3d0] sm:$0xff]  ;;  %v1499_v57 = vsel %vm1142_vm3, %v1447_v31, 0.0  ;;  %v295_v61 = vld [vmem:[%s2566_s22 + $0x300] sm:$0xff]  ;;  %v296_v39 = vld [vmem:[%s2566_s22 + $0x308] sm:$0xff] }
 0x146   : > { %1658 = vadd.xlane.f32.xlu0 %v1657_v54  ;;  %2392 = vmatmul.msk.f32.gmra.mxu3 %vm389_vm1, %v351_v56  ;;  %v1660_v56 = vsel %vm1289_vm2, %v1582_v32, 0.0 }
 0x147   : > { %2380 = vmatmul.msk.f32.gmra.mxu2 %vm389_vm1, %v315_v60  ;;  %v962_v14 = vadd.f32 %v961_v26, %v792_v16  ;;  %v1654_v26 = vsel %vm1142_vm3, %v1580_v30, 0.0  ;;  %659 = vmatmul.f32.gmra.mxu0 %v295_v61  ;;  %v1259_v16 = vmul.f32 %v2784_v51, %v1075_v55 }
 0x148   : > { %v3087_v43 = vpop.xlane.xlu2 %1470  ;;  %v3089_v62 = vpop.xlane.xlu1 %1616  ;;  %829 = vmatmul.f32.gmra.mxu1 %v296_v39 }
 0x149   : > { %v3094_v7 = vpop.xlane.xlu0 %1304  ;;  %v3096_v10 = vpop.f32.mrf.mxu3  ;;  %v1076_v54 = vmax.f32 %v962_v14, 0.0  ;;  %v1345_v32 = vsel %vm1289_vm2, %v1259_v16, 0.0 }
 0x14b   : > { %v624_v15 = vpop.f32.mrf.mxu0  ;;  %v1583_v16 = vmul.f32 %v2840_v46, %v1076_v54 }
 0x14c   : > { %v794_v20 = vpop.f32.mrf.mxu1 }
 0x14d   : > { %1497 = vadd.xlane.f32.xlu2 %v1496_v18  ;;  %1343 = vadd.xlane.f32.xlu1 %v1342_v8  ;;  %v795_v59 = vadd.f32 %v794_v20, %v624_v15  ;;  %v1123_v15 = vmul.f32 %v2789_v52, %v1076_v54  ;;  %v3131_v20 = vand.u32 127, %v1791_v0 }
 0x14e   : > { %1180 = vadd.xlane.f32.xlu0 %v1179_v12 }
 0x14f   : > { %2381 = vmatmul.msk.f32.gmra.mxu2 %vm389_vm1, %v318_v19  ;;  %v965_v18 = vadd.f32 %v964_v28, %v795_v59  ;;  %v1260_v19 = vmul.f32 %v2784_v51, %v1076_v54  ;;  %v1182_v31 = vsel %vm1142_vm3, %v1123_v15, 0.0  ;;  %v299_v59 = vld [vmem:[%s2566_s22 + $0x320] sm:$0xff]  ;;  %v1448_v15 = vmul.f32 %v2831_v40, %v1076_v54 }
 0x150   : > { %v3103_v23 = vpop.xlane.xlu2 %1619  ;;  %v3105_v29 = vpop.xlane.xlu1 %1153  ;;  %832 = vmatmul.f32.gmra.mxu1 %v299_v59  ;;  %v1663_v40 = vsel %vm1142_vm3, %v1583_v16, 0.0  ;;  %v302_v59 = vld [vmem:[%s2566_s22 + $0x338] sm:$0xff] }
 0x151   : > { %v3110_v34 = vpop.xlane.xlu0 %1473  ;;  %v3112_v35 = vpop.f32.mrf.mxu3  ;;  %v1077_v52 = vmax.f32 %v965_v18, 0.0  ;;  %v1348_v28 = vsel %vm1142_vm3, %v1260_v19, 0.0  ;;  %v1502_v54 = vsel %vm1142_vm3, %v1448_v15, 0.0 }
 0x154   : > { %v627_v49 = vpop.f32.mrf.mxu0 }
 0x155   : > { %1655 = vadd.xlane.f32.xlu2 %v1654_v26  ;;  %1661 = vadd.xlane.f32.xlu1 %v1660_v56  ;;  %v797_v60 = vpop.f32.mrf.mxu1  ;;  %v970_v26 = vpop.f32.mrf.mxu2 }
 0x156   : > { %1500 = vadd.xlane.f32.xlu0 %v1499_v57  ;;  %v798_v30 = vadd.f32 %v797_v60, %v627_v49  ;;  %v3141_v57 = vadd.s32 4294967281, %v3131_v20  ;;  %v3144_v49 = vadd.s32 4294967273, %v3131_v20 }
 0x157   : > { %2382 = vmatmul.msk.f32.gmra.mxu2 %vm389_vm1, %v321_v58  ;;  %v298_v58 = vld [vmem:[%s2566_s22 + $0x318] sm:$0xff]  ;;  %vm1855_vm1 = vcmask 1047559  }
 0x158   : > { %v3122_v4 = vpop.xlane.xlu1 %1307  ;;  %v3124_v12 = vpop.xlane.xlu2 %1156  ;;  %662 = vmatmul.f32.gmra.mxu0 %v298_v58  ;;  %v968_v60 = vadd.f32 %v967_v38, %v798_v30  ;;  %v301_v58 = vld [vmem:[%s2566_s22 + $0x330] sm:$0xff]  ;;  %835 = vmatmul.f32.gmra.mxu1 %v302_v59  ;;  %v1917_v24 = vperm.slane %v3075_v45, %v3144_v49  ;;  %v1915_v45 = vperm.slane %v3047_v9, %v3141_v57 }
 0x159   : > { %v3128_v8 = vpop.xlane.xlu0 %1622  ;;  %v3133_v14 = vpop.f32.mrf.mxu3 }
 0x15a   : > { %v3155_v30 = vmax.f32 %v968_v60, 0.0  ;;  %v3168_v60 = vadd.s32 4294967288, %v3131_v20  ;;  %v1919_v9 = vsel %vm1918_vm5, %v1917_v24, %v1915_v45 }
 0x15c   : > { %v630_v55 = vpop.f32.mrf.mxu0  ;;  %v1795_v63 = vperm.slane %v3042_v3, %v3168_v60  ;;  %v1793_v3 = vperm.slane %v3020_v37, %v3131_v20  ;;  %v3323_v37 = vld [vmem:[%s4093_s2 + $0x3] ss:$0 sm:$0xff] }
 0x15d   : > { %1346 = vadd.xlane.f32.xlu2 %v1345_v32  ;;  %1183 = vadd.xlane.f32.xlu1 %v1182_v31  ;;  %v800_v56 = vpop.f32.mrf.mxu1  ;;  %v1584_v32 = vmul.f32 %v2840_v46, %v1077_v52 }
 0x15e   : > { %1349 = vadd.xlane.f32.xlu0 %v1348_v28  ;;  %v801_v51 = vadd.f32 %v800_v56, %v630_v55 }
 0x15f   : > { %v1666_v56 = vsel %vm1296_vm4, %v1584_v32, 0.0 }
 0x160   : > { %v3146_v61 = vpop.xlane.xlu1 %1476  ;;  %v1311_v39 = vpop.xlane.xlu2 %1310  ;;  %v971_v0 = vadd.f32 %v970_v26, %v801_v51  ;;  %665 = vmatmul.f32.gmra.mxu0 %v301_v58  ;;  %v3193_v58 = vadd.s32 4294967265, %v3131_v20 }
 0x161   : > { %v1929_v18 = vperm.slane %v1311_v39, %v3141_v57  ;;  %v1314_v19 = vpop.xlane.xlu0 %1313  ;;  %v3162_v28 = vpop.f32.mrf.mxu3 }
 0x162   : > { %v1930_v31 = vperm.slane %v1314_v19, %v3144_v49  ;;  %v3153_v38 = vmax.f32 %v971_v0, 0.0  ;;  %v973_v39 = vpop.f32.mrf.mxu2  ;;  %v3173_v0 = vld [vmem:[%s4093_s2] ss:$0 sm:$0xff]  ;;  %v3182_v19 = vld [vmem:[%s4093_s2 + $0x1] ss:$0 sm:$0xff] }
 0x163   : > { %v1261_v32 = vmul.f32 %v3182_v19, %v1077_v52  ;;  %v1925_v52 = vperm.slane %v3094_v7, %v3144_v49  ;;  %v1924_v7 = vperm.slane %v3067_v27, %v3141_v57  ;;  %v3226_v27 = vadd.s32 4294967256, %v3131_v20 }
 0x164   : > { %v3158_v55 = vsel %vm1918_vm5, %v1930_v31, %v1929_v18  ;;  %v633_v26 = vpop.f32.mrf.mxu0  ;;  %v1125_v16 = vmul.f32 %v3173_v0, %v3153_v38  ;;  %v1124_v31 = vmul.f32 %v3173_v0, %v3155_v30  ;;  %v1262_v24 = vmul.f32 %v3182_v19, %v3155_v30 }
 0x165   : > { %1664 = vadd.xlane.f32.xlu2 %v1663_v40  ;;  %1503 = vadd.xlane.f32.xlu1 %v1502_v54  ;;  %v803_v51 = vpop.f32.mrf.mxu1  ;;  %v1801_v40 = vperm.slane %v3124_v12, %v3131_v20  ;;  %v1351_v17 = vsel %vm1296_vm4, %v1261_v32, 0.0  ;;  %v1926_v1 = vsel %vm1918_vm5, %v1925_v52, %v1924_v7 }
 0x166   : > { %1667 = vadd.xlane.f32.xlu0 %v1666_v56  ;;  %v804_v21 = vadd.f32 %v803_v51, %v633_v26  ;;  %v1188_v12 = vsel %vm1142_vm3, %v1125_v16, 0.0  ;;  %v1185_v26 = vsel %vm1142_vm3, %v1124_v31, 0.0  ;;  %v1921_v16 = vperm.slane %v3049_v11, %v3193_v58  ;;  %v304_v31 = vld [vmem:[%s2566_s22 + $0x348] sm:$0xff] }
 0x168   : > { %v3177_v15 = vpop.xlane.xlu1 %1625  ;;  %v1160_v18 = vpop.xlane.xlu2 %1159  ;;  %v3216_v32 = vadd.f32 %v973_v39, %v804_v21  ;;  %668 = vmatmul.f32.gmra.mxu0 %v304_v31 }
 0x169   : > { %v1802_v54 = vperm.slane %v1160_v18, %v3168_v60  ;;  %v3190_v56 = vpop.xlane.xlu0 %1631  ;;  %v1927_v18 = vperm.slane %v3122_v4, %v3193_v58  ;;  %v3214_v4 = vadd.s32 4294967264, %v3131_v20 }
 0x16a   : > { %v4096_v5 = vmax.f32 %v3216_v32, 0.0 }
 0x16b   : > { %v3200_v59 = vsel %vm1796_vm6, %v1802_v54, %v1801_v40  ;;  %v305_v54 = vld [vmem:[%s2566_s22 + $0x350] sm:$0xff]  ;;  %v1928_v11 = vsel %vm1922_vm7, %v1927_v18, %v1926_v1  ;;  %v2053_v52 = vperm.slane %v3146_v61, %v3214_v4  ;;  %v1263_v1 = vmul.f32 %v3182_v19, %v3153_v38 }
 0x16c   : > { %v636_v51 = vpop.f32.mrf.mxu0  ;;  %838 = vmatmul.f32.gmra.mxu1 %v305_v54  ;;  %v1923_v18 = vsel %vm1922_vm7, %v1921_v16, %v1919_v9 }
 0x16d   : > { %1352 = vadd.xlane.f32.xlu1 %v1351_v17  ;;  %1186 = vadd.xlane.f32.xlu2 %v1185_v26  ;;  %v806_v40 = vpop.f32.mrf.mxu1  ;;  %v3223_v17 = vadd.s32 4294967241, %v3131_v20  ;;  %v3228_v26 = vpop.f32.mrf.mxu3  ;;  %v1999_v54 = vsel %vm1843_vm9, %v1928_v11, %v1923_v18  ;;  %v1357_v11 = vsel %vm1142_vm3, %v1263_v1, 0.0  ;;  %v307_v18 = vld [vmem:[%s2566_s22 + $0x360] sm:$0xff] }
 0x16e   : > { %1189 = vadd.xlane.f32.xlu0 %v1188_v12  ;;  %v1585_v12 = vmul.f32 %v2840_v46, %v3155_v30  ;;  %v976_v46 = vpop.f32.mrf.mxu2  ;;  %v807_v42 = vadd.f32 %v806_v40, %v636_v51  ;;  %v1354_v51 = vsel %vm1289_vm2, %v1262_v24, 0.0  ;;  %v3260_v40 = vadd.s32 4294967249, %v3131_v20 }
 0x170   : > { %v1480_v21 = vpop.xlane.xlu2 %1479  ;;  %v1317_v39 = vpop.xlane.xlu1 %1316  ;;  %v1669_v9 = vsel %vm1289_vm2, %v1585_v12, 0.0  ;;  %v2165_v12 = vperm.slane %v3103_v23, %v3223_v17  ;;  %671 = vmatmul.f32.gmra.mxu0 %v307_v18  ;;  %v2163_v23 = vperm.slane %v3089_v62, %v3260_v40 }
 0x171   : > { %v2054_v45 = vperm.slane %v1480_v21, %v3226_v27  ;;  %v1932_v7 = vperm.slane %v1317_v39, %v3193_v58  ;;  %v3239_v31 = vpop.xlane.xlu0 %1162  ;;  %v3252_v39 = vadd.s32 4294967233, %v3131_v20 }
 0x172   : > { %v2167_v62 = vsel %vm2166_vm11, %v2165_v12, %v2163_v23  ;;  %v1798_v12 = vperm.slane %v3069_v36, %v3131_v20 }
 0x173   : > { %v3247_v61 = vsel %vm2051_vm8, %v2054_v45, %v2053_v52  ;;  %v1933_v21 = vsel %vm1922_vm7, %v1932_v7, %v3158_v55  ;;  %v977_v55 = vadd.f32 %v976_v46, %v807_v42  ;;  %v1264_v7 = vmul.f32 %v3182_v19, %v4096_v5  ;;  %v3277_v42 = vld [vmem:[%s4093_s2 + $0x2] ss:$0 sm:$0xff] }
 0x174   : > { %v3255_v16 = vsel %vm1845_vm10, %v1933_v21, %v1999_v54  ;;  %v639_v52 = vpop.f32.mrf.mxu0  ;;  %v308_v54 = vld [vmem:[%s2566_s22 + $0x368] sm:$0xff]  ;;  %v2169_v24 = vperm.slane %v3128_v8, %v3252_v39  ;;  %v1449_v46 = vmul.f32 %v3277_v42, %v3155_v30  ;;  %v2175_v18 = vperm.slane %v3190_v56, %v3252_v39 }
 0x175   : > { %1670 = vadd.xlane.f32.xlu1 %v1669_v9  ;;  %1355 = vadd.xlane.f32.xlu2 %v1354_v51  ;;  %v809_v45 = vpop.f32.mrf.mxu1  ;;  %v2172_v9 = vperm.slane %v3177_v15, %v3260_v40  ;;  %v3292_v5 = vpop.f32.mrf.mxu3  ;;  %v3294_v30 = vmax.f32 %v977_v55, 0.0  ;;  %v1799_v15 = vperm.slane %v3105_v29, %v3168_v60 }
 0x176   : > { %1358 = vadd.xlane.f32.xlu0 %v1357_v11  ;;  %841 = vmatmul.f32.gmra.mxu1 %v308_v54  ;;  %v1450_v11 = vmul.f32 %v3277_v42, %v3153_v38  ;;  %4108 = vst [vmem:[#allocation11_spill] sm:$0xff] %v3292_v5  ;;  %v1360_v54 = vsel %vm1296_vm4, %v1264_v7, 0.0  ;;  %v810_v53 = vadd.f32 %v809_v45, %v639_v52  ;;  %v979_v5 = vpop.f32.mrf.mxu2  ;;  %v1505_v7 = vsel %vm1142_vm3, %v1449_v46, 0.0  ;;  %v310_v45 = vld [vmem:[%s2566_s22 + $0x378] sm:$0xff] }
 0x177   : > { %v2171_v56 = vsel %vm2170_vm12, %v2169_v24, %v2167_v62  ;;  %v1126_v52 = vmul.f32 %v3173_v0, %v3294_v30  ;;  %v311_v24 = vld [vmem:[%s2566_s22 + $0x380] sm:$0xff]  ;;  %v1800_v46 = vsel %vm1796_vm6, %v1799_v15, %v1798_v12  ;;  %v1586_v62 = vmul.f32 %v3323_v37, %v3153_v38 }
 0x178   : > { %v1629_v1 = vpop.xlane.xlu2 %1628  ;;  %v3272_v21 = vpop.xlane.xlu1 %1634  ;;  %v1508_v29 = vsel %vm1142_vm3, %v1450_v11, 0.0  ;;  %674 = vmatmul.f32.gmra.mxu0 %v310_v45  ;;  %v1797_v11 = vsel %vm1796_vm6, %v1795_v63, %v1793_v3  ;;  %v2050_v45 = vperm.slane %v3110_v34, %v3226_v27 }
 0x179   : > { %v2173_v8 = vperm.slane %v1629_v1, %v3223_v17  ;;  %v3286_v51 = vpop.xlane.xlu0 %1482  ;;  %v1191_v12 = vsel %vm1142_vm3, %v1126_v52, 0.0 }
 0x17b   : > { %v2174_v1 = vsel %vm2166_vm11, %v2173_v8, %v2172_v9  ;;  %v980_v9 = vadd.f32 %v979_v5, %v810_v53  ;;  %v1804_v53 = vperm.slane %v3239_v31, %v3131_v20 }
 0x17c   : > { %v2176_v55 = vsel %vm2170_vm12, %v2175_v18, %v2174_v1  ;;  %v642_v36 = vpop.f32.mrf.mxu0  ;;  %v4109_v1 = vmax.f32 %v3216_v32, 0.0 }
 0x17d   : > { %1506 = vadd.xlane.f32.xlu2 %v1505_v7  ;;  %1361 = vadd.xlane.f32.xlu1 %v1360_v54  ;;  %v3310_v23 = vsel %vm1843_vm9, %v2176_v55, %v2171_v56  ;;  %v812_v8 = vpop.f32.mrf.mxu1  ;;  %v1844_v55 = vsel %vm1843_vm9, %v1800_v46, %v1797_v11  ;;  %v3344_v32 = vpop.f32.mrf.mxu3  ;;  %v1672_v11 = vsel %vm1142_vm3, %v1586_v62, 0.0  ;;  %v1265_v62 = vmul.f32 %v3182_v19, %v3294_v30 }
 0x17e   : > { %1509 = vadd.xlane.f32.xlu0 %v1508_v29  ;;  %844 = vmatmul.f32.gmra.mxu1 %v311_v24  ;;  %v1587_v56 = vmul.f32 %v3323_v37, %v4109_v1  ;;  %v1846_v38 = vsel %vm1845_vm10, %v3200_v59, %v1844_v55  ;;  %v3340_v29 = vmax.f32 %v980_v9, 0.0  ;;  %v813_v3 = vadd.f32 %v812_v8, %v642_v36  ;;  %v982_v9 = vpop.f32.mrf.mxu2 }
 0x17f   : > { %v2048_v59 = vperm.slane %v3087_v43, %v3214_v4  ;;  %v2056_v43 = vperm.slane %v3286_v51, %v3214_v4 }
 0x180   : > { %v1320_v18 = vpop.xlane.xlu2 %1319  ;;  %v1166_v54 = vpop.xlane.xlu1 %1165  ;;  %v1675_v52 = vsel %vm1296_vm4, %v1587_v56, 0.0  ;;  %v983_v36 = vadd.f32 %v982_v9, %v813_v3  ;;  %v1266_v34 = vmul.f32 %v3182_v19, %v3340_v29  ;;  %v1363_v3 = vsel %vm1289_vm2, %v1265_v62, 0.0 }
 0x181   : > { %v1934_v5 = vperm.slane %v1320_v18, %v3141_v57  ;;  %v1323_v15 = vpop.xlane.xlu0 %1322  ;;  %v1805_v63 = vperm.slane %v1166_v54, %v3168_v60  ;;  %v2052_v8 = vsel %vm2051_vm8, %v2050_v45, %v2048_v59 }
 0x182   : > { %v1935_v7 = vperm.slane %v1323_v15, %v3144_v49  ;;  %v2098_v56 = vsel %vm1843_vm9, %v3247_v61, %v2052_v8 }
 0x183   : > { %v1806_v31 = vsel %vm1796_vm6, %v1805_v63, %v1804_v53  ;;  %v1451_v53 = vmul.f32 %v3277_v42, %v3294_v30 }
 0x184   : > { %v1936_v24 = vsel %vm1918_vm5, %v1935_v7, %v1934_v5  ;;  %v1848_v46 = vsel %vm1847_vm13, %v1806_v31, %v1846_v38  ;;  %v2177_v5 = vperm.slane %v3272_v21, %v3260_v40  ;;  %v1083_v38 = vmax.f32 %v983_v36, 0.0  ;;  %v645_v9 = vpop.f32.mrf.mxu0 }
 0x185   : > { %1673 = vadd.xlane.f32.xlu2 %v1672_v11  ;;  %1192 = vadd.xlane.f32.xlu1 %v1191_v12  ;;  %v1366_v21 = vsel %vm1142_vm3, %v1266_v34, 0.0  ;;  %v1511_v45 = vsel %vm1142_vm3, %v1451_v53, 0.0  ;;  %v1027_v11 = vpop.f32.mrf.mxu3  ;;  %v815_v36 = vpop.f32.mrf.mxu1 }
 0x186   : > { %1676 = vadd.xlane.f32.xlu0 %v1675_v52  ;;  %v858_v52 = vadd.f32 %v3029_v48, %v2823_v33  ;;  %v1590_v59 = vmul.f32 %v3323_v37, %v1083_v38 }
 0x188   : > { %v1638_v18 = vpop.xlane.xlu2 %1637  ;;  %v1486_v54 = vpop.xlane.xlu1 %1485 }
 0x189   : > { %v2178_v15 = vperm.slane %v1638_v18, %v3223_v17  ;;  %v2057_v63 = vperm.slane %v1486_v54, %v3226_v27  ;;  %v1641_v1 = vpop.xlane.xlu0 %1640  ;;  %v1588_v18 = vmul.f32 %v3323_v37, %v3294_v30  ;;  %v1028_v54 = vadd.f32 %v1027_v11, %v858_v52 }
 0x18a   : > { %v2180_v55 = vperm.slane %v1641_v1, %v3252_v39 }
 0x18b   : > { %v2179_v7 = vsel %vm2166_vm11, %v2178_v15, %v2177_v5  ;;  %v2058_v12 = vsel %vm2051_vm8, %v2057_v63, %v2056_v43  ;;  %v1684_v43 = vsel %vm1296_vm4, %v1590_v59, 0.0  ;;  %v816_v15 = vadd.f32 %v815_v36, %v645_v9 }
 0x18c   : > { %v3372_v31 = vsel %vm1845_vm10, %v2058_v12, %v2098_v56  ;;  %v2181_v51 = vsel %vm2170_vm12, %v2180_v55, %v2179_v7  ;;  %v1678_v1 = vsel %vm1289_vm2, %v1588_v18, 0.0  ;;  %v1098_v55 = vmax.f32 %v1028_v54, 0.0  ;;  %v985_v12 = vpop.f32.mrf.mxu2  ;;  %v648_v18 = vpop.f32.mrf.mxu0 }
 0x18d   : > { %v3379_v61 = vsel %vm1845_vm10, %v2181_v51, %v3310_v23  ;;  %1364 = vadd.xlane.f32.xlu2 %v1363_v3  ;;  %1512 = vadd.xlane.f32.xlu1 %v1511_v45  ;;  %v1127_v23 = vmul.f32 %v3173_v0, %v3340_v29  ;;  %v1267_v3 = vmul.f32 %v3182_v19, %v1083_v38 }
 0x18e   : > { %1367 = vadd.xlane.f32.xlu0 %v1366_v21  ;;  %v1605_v52 = vmul.f32 %v3323_v37, %v1098_v55 }
 0x18f   : > { %v1194_v56 = vsel %vm1142_vm3, %v1127_v23, 0.0  ;;  %v818_v23 = vpop.f32.mrf.mxu1 }
 0x190   : > { %v1326_v34 = vpop.xlane.xlu1 %1325  ;;  %v1169_v8 = vpop.xlane.xlu2 %1168 }
 0x191   : > { %v1937_v62 = vperm.slane %v1326_v34, %v3193_v58  ;;  %v1807_v53 = vperm.slane %v1169_v8, %v3131_v20  ;;  %v1172_v5 = vpop.xlane.xlu0 %1171  ;;  %v1369_v34 = vsel %vm1296_vm4, %v1267_v3, 0.0  ;;  %v1729_v8 = vsel %vm1296_vm4, %v1605_v52, 0.0 }
 0x192   : > { %v1808_v33 = vperm.slane %v1172_v5, %v3168_v60  ;;  %v1282_v5 = vmul.f32 %v3182_v19, %v1098_v55  ;;  %v861_v3 = vadd.f32 %v3055_v13, %v2844_v50 }
 0x193   : > { %v1938_v48 = vsel %vm1922_vm7, %v1937_v62, %v1936_v24  ;;  %v986_v24 = vadd.f32 %v985_v12, %v816_v15  ;;  %v1030_v12 = vpop.f32.mrf.mxu3 }
 0x194   : > { %v2001_v30 = vsel %vm1847_vm13, %v1938_v48, %v3255_v16  ;;  %v1809_v63 = vsel %vm1796_vm6, %v1808_v33, %v1807_v53  ;;  %v1452_v16 = vmul.f32 %v3277_v42, %v3340_v29  ;;  %v1589_v53 = vmul.f32 %v3323_v37, %v3340_v29 }
 0x195   : > { %v3399_v7 = vsel %vm1849_vm14, %v1809_v63, %v1848_v46  ;;  %1679 = vadd.xlane.f32.xlu1 %v1678_v1  ;;  %1195 = vadd.xlane.f32.xlu2 %v1194_v56  ;;  %v1084_v59 = vmax.f32 %v986_v24, 0.0  ;;  %v819_v56 = vadd.f32 %v818_v23, %v648_v18  ;;  %v1414_v55 = vsel %vm1296_vm4, %v1282_v5, 0.0 }
 0x196   : > { %1685 = vadd.xlane.f32.xlu0 %v1684_v43  ;;  %v1514_v36 = vsel %vm1142_vm3, %v1452_v16, 0.0  ;;  %v1681_v29 = vsel %vm1142_vm3, %v1589_v53, 0.0  ;;  %v1031_v52 = vadd.f32 %v1030_v12, %v861_v3 }
 0x197   : > { %v1128_v38 = vmul.f32 %v3173_v0, %v1084_v59 }
 0x198   : > { %v1644_v21 = vpop.xlane.xlu1 %1643  ;;  %v1329_v51 = vpop.xlane.xlu2 %1328  ;;  %v1099_v23 = vmax.f32 %v1031_v52, 0.0 }
 0x199   : > { %v1939_v45 = vperm.slane %v1329_v51, %v3141_v57  ;;  %v1332_v11 = vpop.xlane.xlu0 %1331  ;;  %v1197_v1 = vsel %vm1142_vm3, %v1128_v38, 0.0  ;;  %v1453_v38 = vmul.f32 %v3277_v42, %v1084_v59 }
 0x19a   : > { %v1940_v46 = vperm.slane %v1332_v11, %v3144_v49 }
 0x19b   : > { %v1033_v5 = vpop.f32.mrf.mxu3 }
 0x19c   : > { %v1941_v9 = vsel %vm1918_vm5, %v1940_v46, %v1939_v45  ;;  %v988_v45 = vpop.f32.mrf.mxu2 }
 0x19d   : > { %1515 = vadd.xlane.f32.xlu2 %v1514_v36  ;;  %1370 = vadd.xlane.f32.xlu1 %v1369_v34  ;;  %v989_v11 = vadd.f32 %v988_v45, %v819_v56  ;;  %v1268_v36 = vmul.f32 %v3182_v19, %v1084_v59  ;;  %v2182_v34 = vperm.slane %v1644_v21, %v3260_v40 }
 0x19e   : > { %1730 = vadd.xlane.f32.xlu0 %v1729_v8  ;;  %v1138_v56 = vmul.f32 %v3173_v0, %v1099_v23 }
 0x19f   : > { %v3439_v13 = vmax.f32 %v989_v11, 0.0  ;;  %v1372_v53 = vsel %vm1289_vm2, %v1268_v36, 0.0 }
 0x1a0   : > { %v1489_v54 = vpop.xlane.xlu2 %1488  ;;  %v1335_v62 = vpop.xlane.xlu1 %1334  ;;  %v1227_v45 = vsel %vm1142_vm3, %v1138_v56, 0.0 }
 0x1a1   : > { %v2059_v33 = vperm.slane %v1489_v54, %v3214_v4  ;;  %v1492_v48 = vpop.xlane.xlu0 %1491  ;;  %v1942_v43 = vperm.slane %v1335_v62, %v3193_v58 }
 0x1a2   : > { %v2060_v15 = vperm.slane %v1492_v48, %v3226_v27  ;;  %v1269_v48 = vmul.f32 %v3182_v19, %v3439_v13 }
 0x1a3   : > { %v1943_v63 = vsel %vm1922_vm7, %v1942_v43, %v1941_v9  ;;  %v1591_v9 = vmul.f32 %v3323_v37, %v1084_v59  ;;  %v1517_v59 = vsel %vm1142_vm3, %v1453_v38, 0.0  ;;  %v651_v43 = vpop.f32.mrf.mxu0 }
 0x1a4   : > { %v2061_v24 = vsel %vm2051_vm8, %v2060_v15, %v2059_v33  ;;  %v3422_v51 = vsel %vm1849_vm14, %v1943_v63, %v2001_v30  ;;  %v864_v33 = vadd.f32 %v3077_v47, %v2857_v6  ;;  %v821_v15 = vpop.f32.mrf.mxu1  ;;  %v1375_v3 = vsel %vm1142_vm3, %v1269_v48, 0.0 }
 0x1a5   : > { %v3428_v16 = vsel %vm1847_vm13, %v2061_v24, %v3372_v31  ;;  %1682 = vadd.xlane.f32.xlu2 %v1681_v29  ;;  %1415 = vadd.xlane.f32.xlu1 %v1414_v55  ;;  %v1687_v62 = vsel %vm1289_vm2, %v1591_v9, 0.0  ;;  %v822_v6 = vadd.f32 %v821_v15, %v651_v43  ;;  %v867_v43 = vadd.f32 %v3096_v10, %v2870_v25 }
 0x1a6   : > { %1198 = vadd.xlane.f32.xlu0 %v1197_v1  ;;  %v1034_v12 = vadd.f32 %v1033_v5, %v864_v33 }
 0x1a8   : > { %v1647_v46 = vpop.xlane.xlu2 %1646  ;;  %v1175_v30 = vpop.xlane.xlu1 %1174  ;;  %v3461_v52 = vmax.f32 %v1034_v12, 0.0 }
 0x1a9   : > { %v2183_v31 = vperm.slane %v1647_v46, %v3223_v17  ;;  %v1650_v8 = vpop.xlane.xlu0 %1649  ;;  %v991_v46 = vpop.f32.mrf.mxu2  ;;  %v1810_v38 = vperm.slane %v1175_v30, %v3131_v20 }
 0x1aa   : > { %v2185_v18 = vperm.slane %v1650_v8, %v3252_v39  ;;  %v3463_v9 = vadd.f32 %v991_v46, %v822_v6  ;;  %v1592_v8 = vmul.f32 %v3323_v37, %v3439_v13 }
 0x1ab   : > { %v2184_v50 = vsel %vm2166_vm11, %v2183_v31, %v2182_v34  ;;  %v1463_v31 = vmul.f32 %v3277_v42, %v1099_v23 }
 0x1ac   : > { %v2186_v54 = vsel %vm2170_vm12, %v2185_v18, %v2184_v50  ;;  %v1690_v30 = vsel %vm1142_vm3, %v1592_v8, 0.0  ;;  %v870_v8 = vadd.f32 %v3112_v35, %v2885_v44 }
 0x1ad   : > { %v3446_v21 = vsel %vm1847_vm13, %v2186_v54, %v3379_v61  ;;  %1688 = vadd.xlane.f32.xlu1 %v1687_v62  ;;  %1373 = vadd.xlane.f32.xlu2 %v1372_v53  ;;  %v1283_v61 = vmul.f32 %v3182_v19, %v1099_v23  ;;  %v1284_v54 = vmul.f32 %v3182_v19, %v3461_v52  ;;  %v1036_v62 = vpop.f32.mrf.mxu3  ;;  %v1547_v33 = vsel %vm1142_vm3, %v1463_v31, 0.0  ;;  %v824_v31 = vpop.f32.mrf.mxu1 }
 0x1ae   : > { %1518 = vadd.xlane.f32.xlu0 %v1517_v59  ;;  %v1086_v59 = vmax.f32 %v3463_v9, 0.0  ;;  %v3489_v12 = vadd.f32 %v1036_v62, %v867_v43 }
 0x1af   : > { %v1417_v11 = vsel %vm1289_vm2, %v1283_v61, 0.0  ;;  %v1420_v48 = vsel %vm1142_vm3, %v1284_v54, 0.0  ;;  %v1139_v61 = vmul.f32 %v3173_v0, %v3461_v52  ;;  %v1129_v54 = vmul.f32 %v3173_v0, %v3439_v13 }
 0x1b0   : > { %v1338_v63 = vpop.xlane.xlu2 %1337  ;;  %v1495_v1 = vpop.xlane.xlu1 %1494  ;;  %v1593_v15 = vmul.f32 %v3323_v37, %v1086_v59 }
 0x1b1   : > { %v1944_v24 = vperm.slane %v1338_v63, %v3141_v57  ;;  %v1341_v29 = vpop.xlane.xlu0 %1340  ;;  %v1230_v46 = vsel %vm1142_vm3, %v1139_v61, 0.0  ;;  %v994_v43 = vpop.f32.mrf.mxu2 }
 0x1b2   : > { %v1945_v55 = vperm.slane %v1341_v29, %v3144_v49  ;;  %v1693_v6 = vsel %vm1296_vm4, %v1593_v15, 0.0 }
 0x1b4   : > { %v1946_v47 = vsel %vm1918_vm5, %v1945_v55, %v1944_v24  ;;  %v2062_v24 = vperm.slane %v1495_v1, %v3214_v4 }
 0x1b5   : > { %1228 = vadd.xlane.f32.xlu1 %v1227_v45  ;;  %1418 = vadd.xlane.f32.xlu2 %v1417_v11  ;;  %v1039_v45 = vpop.f32.mrf.mxu3 }
 0x1b6   : > { %1376 = vadd.xlane.f32.xlu0 %v1375_v3 }
 0x1b8   : > { %v1653_v36 = vpop.xlane.xlu1 %1652  ;;  %v1178_v34 = vpop.xlane.xlu2 %1177 }
 0x1b9   : > { %v1811_v18 = vperm.slane %v1178_v34, %v3168_v60  ;;  %v1659_v50 = vpop.xlane.xlu0 %1658  ;;  %v1101_v34 = vmax.f32 %v3489_v12, 0.0  ;;  %v2187_v62 = vperm.slane %v1653_v36, %v3260_v40  ;;  %v1200_v36 = vsel %vm1142_vm3, %v1129_v54, 0.0 }
 0x1ba   : > { %v2190_v44 = vperm.slane %v1659_v50, %v3252_v39 }
 0x1bb   : > { %v1812_v53 = vsel %vm1796_vm6, %v1811_v18, %v1810_v38 }
 0x1bc   : > { %v3476_v5 = vsel %vm4097_vm15, %v1812_v53, %v3399_v7  ;;  %v1606_v7 = vmul.f32 %v3323_v37, %v1099_v23 }
 0x1bd   : > { %1548 = vadd.xlane.f32.xlu1 %v1547_v33  ;;  %1691 = vadd.xlane.f32.xlu2 %v1690_v30  ;;  %v1608_v30 = vmul.f32 %v3323_v37, %v1101_v34 }
 0x1be   : > { %1421 = vadd.xlane.f32.xlu0 %v1420_v48  ;;  %v1732_v1 = vsel %vm1289_vm2, %v1606_v7, 0.0 }
 0x1bf   : > { %v1738_v7 = vsel %vm1296_vm4, %v1608_v30, 0.0 }
 0x1c0   : > { %v1498_v63 = vpop.xlane.xlu2 %1497  ;;  %v1344_v56 = vpop.xlane.xlu1 %1343 }
 0x1c1   : > { %v2063_v29 = vperm.slane %v1498_v63, %v3226_v27  ;;  %v1947_v55 = vperm.slane %v1344_v56, %v3193_v58  ;;  %v1181_v25 = vpop.xlane.xlu0 %1180 }
 0x1c3   : > { %v2064_v10 = vsel %vm2051_vm8, %v2063_v29, %v2062_v24  ;;  %v1948_v3 = vsel %vm1922_vm7, %v1947_v55, %v1946_v47  ;;  %v654_v47 = vpop.f32.mrf.mxu0  ;;  %v827_v29 = vpop.f32.mrf.mxu1 }
 0x1c4   : > { %v3499_v23 = vsel %vm1849_vm14, %v2064_v10, %v3428_v16  ;;  %v3503_v11 = vsel %vm4097_vm15, %v1948_v3, %v3422_v51  ;;  %v1040_v16 = vadd.f32 %v1039_v45, %v870_v8  ;;  %v1464_v51 = vmul.f32 %v3277_v42, %v3461_v52 }
 0x1c5   : > { %1733 = vadd.xlane.f32.xlu1 %v1732_v1  ;;  %1231 = vadd.xlane.f32.xlu2 %v1230_v46  ;;  %v825_v35 = vadd.f32 %v824_v31, %v654_v47  ;;  %v1607_v3 = vmul.f32 %v3323_v37, %v3461_v52  ;;  %v1813_v1 = vperm.slane %v1181_v25, %v3131_v20 }
 0x1c6   : > { %1694 = vadd.xlane.f32.xlu0 %v1693_v6  ;;  %v3521_v15 = vmax.f32 %v1040_v16, 0.0  ;;  %v1550_v56 = vsel %vm1142_vm3, %v1464_v51, 0.0  ;;  %v1454_v6 = vmul.f32 %v3277_v42, %v3439_v13 }
 0x1c7   : > { %v995_v50 = vadd.f32 %v994_v43, %v825_v35  ;;  %v1735_v25 = vsel %vm1142_vm3, %v1607_v3, 0.0 }
 0x1c8   : > { %v1656_v38 = vpop.xlane.xlu2 %1655  ;;  %v1662_v18 = vpop.xlane.xlu1 %1661  ;;  %v1140_v45 = vmul.f32 %v3173_v0, %v3521_v15  ;;  %v1520_v51 = vsel %vm1142_vm3, %v1454_v6, 0.0 }
 0x1c9   : > { %v2188_v53 = vperm.slane %v1656_v38, %v3223_v17  ;;  %v1501_v33 = vpop.xlane.xlu0 %1500  ;;  %v1087_v8 = vmax.f32 %v995_v50, 0.0  ;;  %v2192_v43 = vperm.slane %v1662_v18, %v3260_v40 }
 0x1ca   : > { %v1233_v54 = vsel %vm1142_vm3, %v1140_v45, 0.0 }
 0x1cb   : > { %v2189_v48 = vsel %vm2166_vm11, %v2188_v53, %v2187_v62  ;;  %v657_v24 = vpop.f32.mrf.mxu0  ;;  %v997_v62 = vpop.f32.mrf.mxu2  ;;  %v1130_v53 = vmul.f32 %v3173_v0, %v1087_v8 }
 0x1cc   : > { %v2191_v63 = vsel %vm2170_vm12, %v2190_v44, %v2189_v48  ;;  %v828_v52 = vadd.f32 %v827_v29, %v657_v24  ;;  %v1465_v48 = vmul.f32 %v3277_v42, %v3521_v15 }
 0x1cd   : > { %1551 = vadd.xlane.f32.xlu2 %v1550_v56  ;;  %1201 = vadd.xlane.f32.xlu1 %v1200_v36  ;;  %v2250_v61 = vsel %vm1849_vm14, %v2191_v63, %v3446_v21  ;;  %v2065_v63 = vperm.slane %v1501_v33, %v3214_v4  ;;  %v1203_v24 = vsel %vm1142_vm3, %v1130_v53, 0.0 }
 0x1ce   : > { %1739 = vadd.xlane.f32.xlu0 %v1738_v7  ;;  %v998_v30 = vadd.f32 %v997_v62, %v828_v52  ;;  %v1553_v3 = vsel %vm1142_vm3, %v1465_v48, 0.0  ;;  %v1455_v62 = vmul.f32 %v3277_v42, %v1087_v8 }
 0x1d0   : > { %v1347_v55 = vpop.xlane.xlu2 %1346  ;;  %v1184_v10 = vpop.xlane.xlu1 %1183  ;;  %v3562_v9 = vmax.f32 %v998_v30, 0.0 }
 0x1d1   : > { %v1949_v46 = vperm.slane %v1347_v55, %v3141_v57  ;;  %v1350_v21 = vpop.xlane.xlu0 %1349  ;;  %v1814_v47 = vperm.slane %v1184_v10, %v3168_v60 }
 0x1d2   : > { %v1950_v31 = vperm.slane %v1350_v21, %v3144_v49  ;;  %v1131_v6 = vmul.f32 %v3173_v0, %v3562_v9  ;;  %v1272_v53 = vmul.f32 %v3182_v19, %v3562_v9 }
 0x1d3   : > { %v1815_v16 = vsel %vm1796_vm6, %v1814_v47, %v1813_v1  ;;  %v3580_v21 = vpop.f32.mrf.mxu2 }
 0x1d4   : > { %v1951_v38 = vsel %vm1918_vm5, %v1950_v31, %v1949_v46  ;;  %v3543_v13 = vsel %vm4099_vm0, %v1815_v16, %v3476_v5  ;;  %v1270_v5 = vmul.f32 %v3182_v19, %v1086_v59  ;;  %v1271_v46 = vmul.f32 %v3182_v19, %v1087_v8 }
 0x1d5   : > { %1736 = vadd.xlane.f32.xlu2 %v1735_v25  ;;  %1521 = vadd.xlane.f32.xlu1 %v1520_v51  ;;  %v1206_v16 = vsel %vm1142_vm3, %v1131_v6, 0.0 }
 0x1d6   : > { %1234 = vadd.xlane.f32.xlu0 %v1233_v54  ;;  %v1378_v33 = vsel %vm1296_vm4, %v1270_v5, 0.0  ;;  %v1381_v12 = vsel %vm1289_vm2, %v1271_v46, 0.0  ;;  %v1594_v54 = vmul.f32 %v3323_v37, %v1087_v8  ;;  %v830_v8 = vpop.f32.mrf.mxu1 }
 0x1d8   : > { %v1665_v44 = vpop.xlane.xlu2 %1664  ;;  %v1504_v35 = vpop.xlane.xlu1 %1503 }
 0x1d9   : > { %v2193_v56 = vperm.slane %v1665_v44, %v3223_v17  ;;  %v2066_v36 = vperm.slane %v1504_v35, %v3226_v27  ;;  %v1668_v7 = vpop.xlane.xlu0 %1667  ;;  %v1696_v44 = vsel %vm1289_vm2, %v1594_v54, 0.0  ;;  %v1523_v35 = vsel %vm1142_vm3, %v1455_v62, 0.0 }
 0x1da   : > { %v2195_v50 = vperm.slane %v1668_v7, %v3252_v39 }
 0x1db   : > { %v2194_v29 = vsel %vm2166_vm11, %v2193_v56, %v2192_v43  ;;  %v2067_v55 = vsel %vm2051_vm8, %v2066_v36, %v2065_v63  ;;  %v1003_v30 = vpop.f32.mrf.mxu2  ;;  %v1384_v43 = vsel %vm1142_vm3, %v1272_v53, 0.0  ;;  %v660_v63 = vpop.f32.mrf.mxu0  ;;  %v873_v56 = vadd.f32 %v3133_v14, %v2901_v2 }
 0x1dc   : > { %v3566_v59 = vsel %vm4097_vm15, %v2067_v55, %v3499_v23  ;;  %v2196_v18 = vsel %vm2170_vm12, %v2195_v50, %v2194_v29  ;;  %v1285_v23 = vmul.f32 %v3182_v19, %v1101_v34  ;;  %v1609_v50 = vmul.f32 %v3323_v37, %v3521_v15 }
 0x1dd   : > { %v3571_v10 = vsel %vm4097_vm15, %v2196_v18, %v2250_v61  ;;  %1379 = vadd.xlane.f32.xlu1 %v1378_v33  ;;  %1204 = vadd.xlane.f32.xlu2 %v1203_v24  ;;  %v1286_v18 = vmul.f32 %v3182_v19, %v3521_v15  ;;  %v1456_v14 = vmul.f32 %v3277_v42, %v3562_v9  ;;  %vm4098_vm15 = vcmask 261120  }
 0x1de   : > { %1554 = vadd.xlane.f32.xlu0 %v1553_v3  ;;  %v1423_v25 = vsel %vm1296_vm4, %v1285_v23, 0.0 }
 0x1e0   : > { %v1353_v45 = vpop.xlane.xlu1 %1352  ;;  %v1187_v1 = vpop.xlane.xlu2 %1186 }
 0x1e1   : > { %v1952_v61 = vperm.slane %v1353_v45, %v3193_v58  ;;  %v1190_v47 = vpop.xlane.xlu0 %1189  ;;  %v1816_v48 = vperm.slane %v1187_v1, %v3131_v20  ;;  %v1741_v1 = vsel %vm1289_vm2, %v1609_v50, 0.0 }
 0x1e2   : > { %v1817_v5 = vperm.slane %v1190_v47, %v3168_v60 }
 0x1e3   : > { %v1953_v31 = vsel %vm1922_vm7, %v1952_v61, %v1951_v38  ;;  %v1426_v61 = vsel %vm1289_vm2, %v1286_v18, 0.0  ;;  %v1006_v47 = vpop.f32.mrf.mxu2 }
 0x1e4   : > { %v2004_v52 = vsel %vm4099_vm0, %v1953_v31, %v3503_v11  ;;  %v1042_v11 = vpop.f32.mrf.mxu3  ;;  %v1818_v33 = vsel %vm1796_vm6, %v1817_v5, %v1816_v48 }
 0x1e5   : > { %1424 = vadd.xlane.f32.xlu1 %v1423_v25  ;;  %1382 = vadd.xlane.f32.xlu2 %v1381_v12  ;;  %v1043_v24 = vadd.f32 %v1042_v11, %v873_v56  ;;  %v1856_v15 = vsel %vm1855_vm1, %v1818_v33, %v3543_v13  ;;  %v1526_v25 = vsel %vm1142_vm3, %v1456_v14, 0.0  ;;  %v663_v12 = vpop.f32.mrf.mxu0 }
 0x1e6   : > { %1207 = vadd.xlane.f32.xlu0 %v1206_v16  ;;  %v831_v16 = vadd.f32 %v830_v8, %v660_v63 }
 0x1e7   : > { %v1103_v23 = vmax.f32 %v1043_v24, 0.0 }
 0x1e8   : > { %v3589_v34 = vpop.xlane.xlu1 %1670  ;;  %v1356_v51 = vpop.xlane.xlu2 %1355  ;;  %v1001_v53 = vadd.f32 %v3580_v21, %v831_v16 }
 0x1e9   : > { %v1359_v38 = vpop.xlane.xlu0 %1358  ;;  %v1954_v36 = vperm.slane %v1356_v51, %v3141_v57  ;;  %v833_v51 = vpop.f32.mrf.mxu1  ;;  %v1141_v13 = vmul.f32 %v3173_v0, %v1103_v23 }
 0x1ea   : > { %v1955_v7 = vperm.slane %v1359_v38, %v3144_v49 }
 0x1eb   : > { %v1236_v48 = vsel %vm1142_vm3, %v1141_v13, 0.0  ;;  %v3641_v63 = vpop.f32.mrf.mxu2 }
 0x1ec   : > { %v1956_v6 = vsel %vm1918_vm5, %v1955_v7, %v1954_v36  ;;  %v1045_v38 = vpop.f32.mrf.mxu3  ;;  %v1466_v36 = vmul.f32 %v3277_v42, %v1103_v23  ;;  %v1610_v7 = vmul.f32 %v3323_v37, %v1103_v23 }
 0x1ed   : > { %1697 = vadd.xlane.f32.xlu1 %v1696_v44  ;;  %1524 = vadd.xlane.f32.xlu2 %v1523_v35  ;;  %v1287_v44 = vmul.f32 %v3182_v19, %v1103_v23  ;;  %v834_v35 = vadd.f32 %v833_v51, %v663_v12 }
 0x1ee   : > { %1385 = vadd.xlane.f32.xlu0 %v1384_v43  ;;  %v1089_v43 = vmax.f32 %v1001_v53, 0.0 }
 0x1ef   : > { %v1429_v0 = vsel %vm1142_vm3, %v1287_v44, 0.0  ;;  %v1004_v21 = vadd.f32 %v1003_v30, %v834_v35 }
 0x1f0   : > { %v3606_v29 = vpop.xlane.xlu2 %1506  ;;  %v1362_v55 = vpop.xlane.xlu1 %1361  ;;  %v1596_v18 = vmul.f32 %v3323_v37, %v1089_v43  ;;  %v1273_v12 = vmul.f32 %v3182_v19, %v1089_v43 }
 0x1f1   : > { %v3611_v3 = vpop.xlane.xlu0 %1509  ;;  %v1957_v2 = vperm.slane %v1362_v55, %v3193_v58  ;;  %v3650_v14 = vmax.f32 %v1004_v21, 0.0  ;;  %v4111_v21 = vld [vmem:[#allocation11_spill] sm:$0xff] }
 0x1f3   : > { %v1958_v45 = vsel %vm1922_vm7, %v1957_v2, %v1956_v6  ;;  %v666_v2 = vpop.f32.mrf.mxu0  ;;  %v1556_v6 = vsel %vm1142_vm3, %v1466_v36, 0.0  ;;  %v1274_v51 = vmul.f32 %v3182_v19, %v3650_v14  ;;  %v3670_v53 = vpop.f32.mrf.mxu2  ;;  %v2069_v19 = vperm.slane %v3611_v3, %v3226_v27 }
 0x1f4   : > { %v2005_v46 = vsel %vm1855_vm1, %v1958_v45, %v2004_v52  ;;  %v1595_v52 = vmul.f32 %v3323_v37, %v3562_v9  ;;  %v876_v9 = vadd.f32 %v3162_v28, %v2917_v22  ;;  %v836_v22 = vpop.f32.mrf.mxu1  ;;  %v1048_v28 = vpop.f32.mrf.mxu3  ;;  %v1744_v45 = vsel %vm1142_vm3, %v1610_v7, 0.0 }
 0x1f5   : > { %v3624_v31 = vsel %vm1142_vm3, %v1856_v15, %v2005_v46  ;;  %1742 = vadd.xlane.f32.xlu1 %v1741_v1  ;;  %1427 = vadd.xlane.f32.xlu2 %v1426_v61  ;;  %v879_v1 = vadd.f32 %v3228_v26, %v2935_v41  ;;  %v837_v15 = vadd.f32 %v836_v22, %v666_v2  ;;  %v1702_v46 = vsel %vm1296_vm4, %v1596_v18, 0.0 }
 0x1f6   : > { %1527 = vadd.xlane.f32.xlu0 %v1526_v25  ;;  %v1699_v5 = vsel %vm1142_vm3, %v1595_v52, 0.0  ;;  %v1046_v50 = vadd.f32 %v1045_v38, %v876_v9  ;;  %v4110_v9 = vld [vmem:[#allocation6_spill] sm:$0xff] }
 0x1f7   : > { %v3658_v61 = vadd.f32 %v1048_v28, %v879_v1  ;;  %v1007_v41 = vadd.f32 %v1006_v47, %v837_v15  ;;  %v1387_v47 = vsel %vm1296_vm4, %v1273_v12, 0.0 }
 0x1f8   : > { %v3627_v54 = vpop.xlane.xlu2 %1673  ;;  %v1193_v62 = vpop.xlane.xlu1 %1192  ;;  %v1104_v23 = vmax.f32 %v1046_v50, 0.0 }
 0x1f9   : > { %v3633_v11 = vpop.xlane.xlu0 %1676  ;;  %v1819_v13 = vperm.slane %v1193_v62, %v3131_v20  ;;  %v1105_v44 = vmax.f32 %v3658_v61, 0.0  ;;  %v1390_v62 = vsel %vm1289_vm2, %v1274_v51, 0.0  ;;  %v3682_v43 = vmax.f32 %v1007_v41, 0.0 }
 0x1fa   : > { %v1611_v38 = vmul.f32 %v3323_v37, %v1104_v23 }
 0x1fb   : > { %v3717_v12 = vpop.f32.mrf.mxu2 }
 0x1fc   : > { %v839_v1 = vpop.f32.mrf.mxu1 }
 0x1fd   : > { %1237 = vadd.xlane.f32.xlu1 %v1236_v48  ;;  %1700 = vadd.xlane.f32.xlu2 %v1699_v5  ;;  %v2068_v48 = vperm.slane %v3606_v29, %v3214_v4  ;;  %v1051_v5 = vpop.f32.mrf.mxu3  ;;  %v3690_v29 = vld [vmem:[%s4093_s2 + $0x1] ss:$0 sm:$0xff] }
 0x1fe   : > { %1430 = vadd.xlane.f32.xlu0 %v1429_v0  ;;  %v1747_v0 = vsel %vm1296_vm4, %v1611_v38, 0.0  ;;  %v1288_v3 = vmul.f32 %v3690_v29, %v1104_v23  ;;  %v1275_v28 = vmul.f32 %v3690_v29, %v3682_v43  ;;  %v3734_v38 = vld [vmem:[%s4093_s2] ss:$0 sm:$0xff] }
 0x1ff   : > { %v2070_v7 = vsel %vm2051_vm8, %v2069_v19, %v2068_v48 }
 0x200   : > { %v1365_v8 = vpop.xlane.xlu2 %1364  ;;  %v3643_v56 = vpop.xlane.xlu1 %1512  ;;  %v2103_v23 = vsel %vm4099_vm0, %v2070_v7, %v3566_v59  ;;  %v2200_v59 = vperm.slane %v3633_v11, %v3252_v39  ;;  %v1132_v11 = vmul.f32 %v3734_v38, %v3650_v14 }
 0x201   : > { %v1959_v24 = vperm.slane %v1365_v8, %v3141_v57  ;;  %v1368_v55 = vpop.xlane.xlu0 %1367  ;;  %v882_v8 = vadd.f32 %v4111_v21, %v4110_v9  ;;  %v2071_v18 = vperm.slane %v3643_v56, %v3214_v4 }
 0x202   : > { %v1960_v33 = vperm.slane %v1368_v55, %v3144_v49  ;;  %v1467_v55 = vmul.f32 %v3277_v42, %v1105_v44 }
 0x203   : > { %v3693_v36 = vadd.f32 %v1051_v5, %v882_v8 }
 0x204   : > { %v1961_v30 = vsel %vm1918_vm5, %v1960_v33, %v1959_v24 }
 0x205   : > { %1557 = vadd.xlane.f32.xlu1 %v1556_v6  ;;  %1745 = vadd.xlane.f32.xlu2 %v1744_v45  ;;  %v2198_v6 = vperm.slane %v3627_v54, %v3223_v17  ;;  %v669_v45 = vpop.f32.mrf.mxu0  ;;  %v2197_v54 = vperm.slane %v3589_v34, %v3260_v40 }
 0x206   : > { %1703 = vadd.xlane.f32.xlu0 %v1702_v46  ;;  %v1432_v46 = vsel %vm1296_vm4, %v1288_v3, 0.0  ;;  %v1209_v3 = vsel %vm1142_vm3, %v1132_v11, 0.0 }
 0x207   : > { %v2199_v34 = vsel %vm2166_vm11, %v2198_v6, %v2197_v54 }
 0x208   : > { %v3660_v16 = vpop.xlane.xlu1 %1679  ;;  %v1196_v25 = vpop.xlane.xlu2 %1195 }
 0x209   : > { %v1820_v26 = vperm.slane %v1196_v25, %v3168_v60  ;;  %v3667_v52 = vpop.xlane.xlu0 %1685  ;;  %v1106_v25 = vmax.f32 %v3693_v36, 0.0  ;;  %v2202_v5 = vperm.slane %v3660_v16, %v3260_v40  ;;  %v2272_v16 = vstv %s3723_s14 }
 0x20a   : > { %v2205_v8 = vperm.slane %v3667_v52, %v3252_v39 }
 0x20b   : > { %v3674_v35 = vsel %vm1796_vm6, %v1820_v26, %v1819_v13  ;;  %v1559_v13 = vsel %vm1142_vm3, %v1467_v55, 0.0  ;;  %v1393_v26 = vsel %vm1142_vm3, %v1275_v28, 0.0 }
 0x20d   : > { %1388 = vadd.xlane.f32.xlu1 %v1387_v47  ;;  %1391 = vadd.xlane.f32.xlu2 %v1390_v62  ;;  %v1133_v47 = vmul.f32 %v3734_v38, %v3682_v43  ;;  %v2201_v62 = vsel %vm2170_vm12, %v2200_v59, %v2199_v34  ;;  %v672_v6 = vpop.f32.mrf.mxu0 }
 0x20e   : > { %1748 = vadd.xlane.f32.xlu0 %v1747_v0  ;;  %v2252_v7 = vsel %vm4099_vm0, %v2201_v62, %v3571_v10  ;;  %vm2275_vm0 = vcmask 523264  }
 0x210   : > { %v1516_v50 = vpop.xlane.xlu2 %1515  ;;  %v1371_v24 = vpop.xlane.xlu1 %1370 }
 0x211   : > { %v2072_v33 = vperm.slane %v1516_v50, %v3226_v27  ;;  %v3702_v2 = vpop.xlane.xlu0 %1730  ;;  %v1962_v22 = vperm.slane %v1371_v24, %v3193_v58  ;;  %v1212_v50 = vsel %vm1142_vm3, %v1133_v47, 0.0 }
 0x213   : > { %v2073_v56 = vsel %vm2051_vm8, %v2072_v33, %v2071_v18  ;;  %v3713_v15 = vsel %vm1922_vm7, %v1962_v22, %v1961_v30  ;;  %v840_v30 = vadd.f32 %v839_v1, %v669_v45  ;;  %v1018_v18 = vpop.f32.mrf.mxu2  ;;  %v4112_v33 = vld [vmem:[#allocation3_spill] sm:$0xff]  ;;  %v4113_v22 = vld [vmem:[#allocation8_spill] sm:$0xff] }
 0x214   : > { %v2104_v51 = vsel %vm1855_vm1, %v2073_v56, %v2103_v23  ;;  %v849_v28 = vadd.f32 %v4113_v22, %v4112_v33  ;;  %v3780_v56 = vld [vmem:[%s4093_s2 + $0x2] ss:$0 sm:$0xff] }
 0x215   : > { %v2266_v41 = vsel %vm4098_vm15, %v3624_v31, %v2104_v51  ;;  %1433 = vadd.xlane.f32.xlu1 %v1432_v46  ;;  %1560 = vadd.xlane.f32.xlu2 %v1559_v13  ;;  %v1468_v31 = vmul.f32 %v3277_v42, %v1106_v25  ;;  %v3749_v0 = vadd.f32 %v3641_v63, %v840_v30  ;;  %vm2268_vm15 = vcmask 392192   ;;  %v842_v13 = vpop.f32.mrf.mxu1 }
 0x216   : > { %1394 = vadd.xlane.f32.xlu0 %v1393_v26  ;;  %v1457_v46 = vmul.f32 %v3780_v56, %v3650_v14  ;;  %v1458_v54 = vmul.f32 %v3780_v56, %v3682_v43  ;;  %v1019_v51 = vadd.f32 %v1018_v18, %v849_v28 }
 0x217   : > { %v1092_v24 = vmax.f32 %v3749_v0, 0.0  ;;  %v1562_v52 = vsel %vm1142_vm3, %v1468_v31, 0.0  ;;  %v1598_v0 = vmul.f32 %v3323_v37, %v3682_v43 }
 0x218   : > { %v1683_v48 = vpop.xlane.xlu2 %1682  ;;  %v3738_v19 = vpop.xlane.xlu1 %1415  ;;  %v1529_v26 = vsel %vm1142_vm3, %v1457_v46, 0.0  ;;  %v1532_v34 = vsel %vm1142_vm3, %v1458_v54, 0.0  ;;  %v1095_v11 = vmax.f32 %v1019_v51, 0.0 }
 0x219   : > { %v2203_v9 = vperm.slane %v1683_v48, %v3223_v17  ;;  %v3752_v21 = vpop.xlane.xlu0 %1198  ;;  %v1599_v30 = vmul.f32 %v3323_v37, %v1092_v24  ;;  %v1276_v28 = vmul.f32 %v3690_v29, %v1092_v24 }
 0x21b   : > { %v2204_v42 = vsel %vm2166_vm11, %v2203_v9, %v2202_v5  ;;  %v1711_v48 = vsel %vm1296_vm4, %v1599_v30, 0.0  ;;  %v1597_v5 = vmul.f32 %v3323_v37, %v3650_v14  ;;  %v4114_v14 = vld [vmem:[#allocation4_spill] sm:$0xff] }
 0x21c   : > { %v2206_v63 = vsel %vm2170_vm12, %v2205_v8, %v2204_v42  ;;  %v1602_v8 = vmul.f32 %v3323_v37, %v1095_v11 }
 0x21d   : > { %v2253_v55 = vsel %vm1855_vm1, %v2206_v63, %v2252_v7  ;;  %1210 = vadd.xlane.f32.xlu1 %v1209_v3  ;;  %1213 = vadd.xlane.f32.xlu2 %v1212_v50  ;;  %v1021_v7 = vpop.f32.mrf.mxu2 }
 0x21e   : > { %v2269_v10 = vsel %vm2268_vm15, %v2266_v41, %v2253_v55  ;;  %1563 = vadd.xlane.f32.xlu0 %v1562_v52  ;;  %v843_v41 = vadd.f32 %v842_v13, %v672_v6  ;;  %v1708_v55 = vsel %vm1142_vm3, %v1598_v0, 0.0  ;;  %v4115_v52 = vld [vmem:[#allocation9_spill] sm:$0xff]  ;;  %v1720_v37 = vsel %vm1296_vm4, %v1602_v8, 0.0 }
 0x21f   : > { %v2273_v45 = vadd.f32 %v2272_v16, %v2269_v10  ;;  %v852_v18 = vadd.f32 %v4115_v52, %v4114_v14  ;;  %v675_v10 = vpop.f32.mrf.mxu0 }
 0x220   : > { %v1689_v1 = vpop.xlane.xlu1 %1688  ;;  %v1374_v23 = vpop.xlane.xlu2 %1373  ;;  %v1013_v31 = vadd.f32 %v3670_v53, %v843_v41  ;;  %v1705_v53 = vsel %vm1289_vm2, %v1597_v5, 0.0 }
 0x221   : > { %2276 = vst.msk [vmem:[%s3770_s3] sm:$0xff] %vm2275_vm0, %v2273_v45  ;;  %v3788_v59 = vpop.xlane.xlu0 %1518  ;;  %v1964_v42 = vperm.slane %v1374_v23, %v3141_v57  ;;  %v1022_v43 = vadd.f32 %v1021_v7, %v852_v18  ;;  %v845_v45 = vpop.f32.mrf.mxu1  ;;  %v2207_v23 = vperm.slane %v1689_v1, %v3260_v40 }
 0x222   : > { %v1093_v63 = vmax.f32 %v1013_v31, 0.0 }
 0x223   : > { %v1096_v41 = vmax.f32 %v1022_v43, 0.0  ;;  %v4116_v43 = vld [vmem:[#allocation5_spill] sm:$0xff] }
 0x224   : > { %v1277_v6 = vmul.f32 %v3690_v29, %v1093_v63  ;;  %v1134_v51 = vmul.f32 %v3734_v38, %v1093_v63 }
 0x225   : > { %1530 = vadd.xlane.f32.xlu1 %v1529_v26  ;;  %1533 = vadd.xlane.f32.xlu2 %v1532_v34  ;;  %v846_v34 = vadd.f32 %v845_v45, %v675_v10  ;;  %v1136_v8 = vmul.f32 %v3734_v38, %v1096_v41  ;;  %v4117_v10 = vld [vmem:[#allocation10_spill] sm:$0xff] }
 0x226   : > { %1712 = vadd.xlane.f32.xlu0 %v1711_v48  ;;  %v1396_v48 = vsel %vm1296_vm4, %v1276_v28, 0.0  ;;  %v1399_v1 = vsel %vm1289_vm2, %v1277_v6, 0.0  ;;  %v1215_v31 = vsel %vm1142_vm3, %v1134_v51, 0.0 }
 0x227   : > { %v1221_v18 = vsel %vm1142_vm3, %v1136_v8, 0.0 }
 0x228   : > { %v1229_v47 = vpop.xlane.xlu1 %1228  ;;  %v1419_v62 = vpop.xlane.xlu2 %1418 }
 0x229   : > { %v1377_v9 = vpop.xlane.xlu0 %1376  ;;  %v1989_v13 = vperm.slane %v1419_v62, %v3141_v57  ;;  %v1016_v62 = vadd.f32 %v3717_v12, %v846_v34 }
 0x22a   : > { %v1965_v3 = vperm.slane %v1377_v9, %v3144_v49  ;;  %v1279_v9 = vmul.f32 %v3690_v29, %v1095_v11 }
 0x22b   : > { %v3834_v52 = vmax.f32 %v1016_v62, 0.0 }
 0x22c   : > { %v3803_v50 = vsel %vm1918_vm5, %v1965_v3, %v1964_v42  ;;  %v1837_v42 = vperm.slane %v1229_v47, %v3131_v20  ;;  %v1405_v11 = vsel %vm1296_vm4, %v1279_v9, 0.0  ;;  %v1024_v47 = vpop.f32.mrf.mxu2 }
 0x22d   : > { %1706 = vadd.xlane.f32.xlu1 %v1705_v53  ;;  %1709 = vadd.xlane.f32.xlu2 %v1708_v55  ;;  %v1459_v53 = vmul.f32 %v3780_v56, %v1093_v63  ;;  %v1278_v51 = vmul.f32 %v3690_v29, %v3834_v52 }
 0x22e   : > { %1721 = vadd.xlane.f32.xlu0 %v1720_v37 }
 0x22f   : > { %v1535_v37 = vsel %vm1142_vm3, %v1459_v53, 0.0 }
 0x230   : > { %v1549_v33 = vpop.xlane.xlu1 %1548  ;;  %v1692_v22 = vpop.xlane.xlu2 %1691 }
 0x231   : > { %v2208_v46 = vperm.slane %v1692_v22, %v3223_v17  ;;  %v1422_v54 = vpop.xlane.xlu0 %1421  ;;  %v855_v22 = vadd.f32 %v4117_v10, %v4116_v43 }
 0x232   : > { %v1990_v30 = vperm.slane %v1422_v54, %v3144_v49  ;;  %v1280_v54 = vmul.f32 %v3690_v29, %v1096_v41 }
 0x233   : > { %v2209_v26 = vsel %vm2166_vm11, %v2208_v46, %v2207_v23  ;;  %v1025_v28 = vadd.f32 %v1024_v47, %v855_v22  ;;  %v3847_v23 = vld [vmem:[%s4093_s2 + $0x3] ss:$0 sm:$0xff] }
 0x234   : > { %v3819_v24 = vsel %vm1918_vm5, %v1990_v30, %v1989_v13  ;;  %v1600_v46 = vmul.f32 %v3847_v23, %v1093_v63  ;;  %v1822_v13 = vperm.slane %v3752_v21, %v3131_v20  ;;  %v2089_v30 = vperm.slane %v1549_v33, %v3214_v4 }
 0x235   : > { %1397 = vadd.xlane.f32.xlu1 %v1396_v48  ;;  %1400 = vadd.xlane.f32.xlu2 %v1399_v1  ;;  %v1408_v21 = vsel %vm1289_vm2, %v1280_v54, 0.0  ;;  %v1402_v33 = vsel %vm1142_vm3, %v1278_v51, 0.0 }
 0x236   : > { %1216 = vadd.xlane.f32.xlu0 %v1215_v31  ;;  %v1097_v31 = vmax.f32 %v1025_v28, 0.0 }
 0x238   : > { %v1734_v5 = vpop.xlane.xlu1 %1733  ;;  %v1232_v0 = vpop.xlane.xlu2 %1231  ;;  %v1281_v51 = vmul.f32 %v3690_v29, %v1097_v31 }
 0x239   : > { %v1838_v3 = vperm.slane %v1232_v0, %v3168_v60  ;;  %v1695_v7 = vpop.xlane.xlu0 %1694  ;;  %v1714_v0 = vsel %vm1289_vm2, %v1600_v46, 0.0  ;;  %v2232_v53 = vperm.slane %v1734_v5, %v3260_v40 }
 0x23a   : > { %v2210_v55 = vperm.slane %v1695_v7, %v3252_v39  ;;  %v1137_v7 = vmul.f32 %v3734_v38, %v1097_v31 }
 0x23b   : > { %v3832_v14 = vsel %vm1796_vm6, %v1838_v3, %v1837_v42  ;;  %v1603_v42 = vmul.f32 %v3847_v23, %v1096_v41  ;;  %v1461_v3 = vmul.f32 %v3780_v56, %v1096_v41 }
 0x23c   : > { %v3837_v12 = vsel %vm2170_vm12, %v2210_v55, %v2209_v26  ;;  %v1224_v10 = vsel %vm1142_vm3, %v1137_v7, 0.0 }
 0x23d   : > { %1406 = vadd.xlane.f32.xlu1 %v1405_v11  ;;  %1222 = vadd.xlane.f32.xlu2 %v1221_v18  ;;  %v1541_v5 = vsel %vm1142_vm3, %v1461_v3, 0.0 }
 0x23e   : > { %1536 = vadd.xlane.f32.xlu0 %v1535_v37 }
 0x240   : > { %v1552_v6 = vpop.xlane.xlu2 %1551  ;;  %v1202_v45 = vpop.xlane.xlu1 %1201 }
 0x241   : > { %v2090_v26 = vperm.slane %v1552_v6, %v3226_v27  ;;  %v1823_v34 = vperm.slane %v1202_v45, %v3168_v60  ;;  %v1740_v48 = vpop.xlane.xlu0 %1739  ;;  %v1601_v6 = vmul.f32 %v3847_v23, %v3834_v52  ;;  %v1135_v45 = vmul.f32 %v3734_v38, %v3834_v52 }
 0x242   : > { %v2235_v47 = vperm.slane %v1740_v48, %v3252_v39  ;;  %v1411_v38 = vsel %vm1142_vm3, %v1281_v51, 0.0  ;;  %v1054_v48 = vpop.f32.mrf.mxu3 }
 0x243   : > { %v3859_v1 = vsel %vm2051_vm8, %v2090_v26, %v2089_v30  ;;  %v1824_v63 = vsel %vm1796_vm6, %v1823_v34, %v1822_v13  ;;  %v1717_v26 = vsel %vm1142_vm3, %v1601_v6, 0.0  ;;  %v1218_v34 = vsel %vm1142_vm3, %v1135_v45, 0.0 }
 0x244   : > { %v1857_v62 = vsel %vm1843_vm9, %v1824_v63, %v3674_v35  ;;  %v2074_v35 = vperm.slane %v3788_v59, %v3214_v4  ;;  %v1723_v59 = vsel %vm1289_vm2, %v1603_v42, 0.0  ;;  %v4118_v63 = vld [vmem:[#allocation7_spill] sm:$0xff]  ;;  %v1462_v42 = vmul.f32 %v3780_v56, %v1097_v31 }
 0x245   : > { %1715 = vadd.xlane.f32.xlu1 %v1714_v0  ;;  %1409 = vadd.xlane.f32.xlu2 %v1408_v21  ;;  %v885_v29 = vadd.f32 %v3344_v32, %v4118_v63 }
 0x246   : > { %1403 = vadd.xlane.f32.xlu0 %v1402_v33 }
 0x247   : > { %v1055_v33 = vadd.f32 %v1054_v48, %v885_v29 }
 0x248   : > { %v1737_v9 = vpop.xlane.xlu2 %1736  ;;  %v1522_v8 = vpop.xlane.xlu1 %1521 }
 0x249   : > { %v2233_v55 = vperm.slane %v1737_v9, %v3223_v17  ;;  %v2075_v11 = vperm.slane %v1522_v8, %v3226_v27  ;;  %v3875_v18 = vpop.xlane.xlu0 %1234 }
 0x24b   : > { %v2234_v37 = vsel %vm2166_vm11, %v2233_v55, %v2232_v53  ;;  %v3880_v43 = vsel %vm2051_vm8, %v2075_v11, %v2074_v35  ;;  %v1107_v55 = vmax.f32 %v1055_v33, 0.0 }
 0x24c   : > { %v3883_v41 = vsel %vm2170_vm12, %v2235_v47, %v2234_v37 }
 0x24d   : > { %1724 = vadd.xlane.f32.xlu1 %v1723_v59  ;;  %1542 = vadd.xlane.f32.xlu2 %v1541_v5  ;;  %v1614_v59 = vmul.f32 %v3847_v23, %v1107_v55 }
 0x24e   : > { %1225 = vadd.xlane.f32.xlu0 %v1224_v10 }
 0x250   : > { %v1380_v22 = vpop.xlane.xlu1 %1379  ;;  %v1205_v28 = vpop.xlane.xlu2 %1204 }
 0x251   : > { %v3892_v46 = vpop.xlane.xlu0 %1554  ;;  %v1967_v54 = vperm.slane %v1380_v22, %v3193_v58  ;;  %v1825_v3 = vperm.slane %v1205_v28, %v3131_v20 }
 0x253   : > { %v1968_v13 = vsel %vm1922_vm7, %v1967_v54, %v3803_v50  ;;  %v1604_v50 = vmul.f32 %v3847_v23, %v1097_v31  ;;  %v1613_v31 = vmul.f32 %v3847_v23, %v1106_v25 }
 0x254   : > { %v3900_v30 = vsel %vm1843_vm9, %v1968_v13, %v3713_v15  ;;  %v1460_v15 = vmul.f32 %v3780_v56, %v3834_v52  ;;  %v1544_v56 = vsel %vm1142_vm3, %v1462_v42, 0.0 }
 0x255   : > { %1718 = vadd.xlane.f32.xlu2 %v1717_v26  ;;  %1219 = vadd.xlane.f32.xlu1 %v1218_v34  ;;  %v1726_v53 = vsel %vm1142_vm3, %v1604_v50, 0.0  ;;  %v1753_v28 = vsel %vm1142_vm3, %v1613_v31, 0.0  ;;  %v1840_v34 = vperm.slane %v3875_v18, %v3131_v20 }
 0x256   : > { %1412 = vadd.xlane.f32.xlu0 %v1411_v38  ;;  %v1538_v52 = vsel %vm1142_vm3, %v1460_v15, 0.0 }
 0x258   : > { %v1425_v0 = vpop.xlane.xlu1 %1424  ;;  %v1383_v21 = vpop.xlane.xlu2 %1382 }
 0x259   : > { %v1992_v9 = vperm.slane %v1425_v0, %v3193_v58  ;;  %v1208_v8 = vpop.xlane.xlu0 %1207 }
 0x25a   : > { %v1826_v7 = vperm.slane %v1208_v8, %v3168_v60 }
 0x25b   : > { %v3916_v32 = vsel %vm1922_vm7, %v1992_v9, %v3819_v24  ;;  %v1612_v24 = vmul.f32 %v3847_v23, %v1105_v44  ;;  %v1756_v44 = vsel %vm1296_vm4, %v1614_v59, 0.0  ;;  %v2092_v9 = vperm.slane %v3892_v46, %v3214_v4 }
 0x25c   : > { %v1827_v35 = vsel %vm1796_vm6, %v1826_v7, %v1825_v3 }
 0x25d   : > { %v3922_v11 = vsel %vm1845_vm10, %v1827_v35, %v1857_v62  ;;  %1727 = vadd.xlane.f32.xlu2 %v1726_v53  ;;  %1539 = vadd.xlane.f32.xlu1 %v1538_v52  ;;  %v1969_v62 = vperm.slane %v1383_v21, %v3141_v57  ;;  %v1750_v61 = vsel %vm1289_vm2, %v1612_v24, 0.0  ;;  %vm4119_vm2 = vcmask 1045509  }
 0x25e   : > { %1545 = vadd.xlane.f32.xlu0 %v1544_v56  ;;  %vm4120_vm4 = vmmov %vm4119_vm2 }
 0x260   : > { %v1698_v47 = vpop.xlane.xlu1 %1697  ;;  %v1525_v37 = vpop.xlane.xlu2 %1524 }
 0x261   : > { %v1386_v5 = vpop.xlane.xlu0 %1385  ;;  %v2077_v23 = vperm.slane %v1525_v37, %v3214_v4  ;;  %v2212_v38 = vperm.slane %v1698_v47, %v3260_v40 }
 0x262   : > { %v1970_v10 = vperm.slane %v1386_v5, %v3144_v49 }
 0x264   : > { %v1971_v22 = vsel %vm1918_vm5, %v1970_v10, %v1969_v62 }
 0x265   : > { %1754 = vadd.xlane.f32.xlu2 %v1753_v28  ;;  %1751 = vadd.xlane.f32.xlu1 %v1750_v61 }
 0x266   : > { %1757 = vadd.xlane.f32.xlu0 %v1756_v44 }
 0x268   : > { %v1743_v36 = vpop.xlane.xlu1 %1742  ;;  %v1428_v25 = vpop.xlane.xlu2 %1427 }
 0x269   : > { %v1528_v6 = vpop.xlane.xlu0 %1527  ;;  %v1994_v0 = vperm.slane %v1428_v25, %v3141_v57  ;;  %v2237_v8 = vperm.slane %v1743_v36, %v3260_v40 }
 0x26a   : > { %v2078_v45 = vperm.slane %v1528_v6, %v3226_v27 }
 0x26c   : > { %v2079_v54 = vsel %vm2051_vm8, %v2078_v45, %v2077_v23 }
 0x26d   : > { %v3943_v51 = vsel %vm1843_vm9, %v2079_v54, %v3880_v43 }
 0x270   : > { %v1238_v13 = vpop.xlane.xlu1 %1237  ;;  %v1701_v26 = vpop.xlane.xlu2 %1700 }
 0x271   : > { %v1841_v48 = vperm.slane %v1238_v13, %v3168_v60  ;;  %v2213_v63 = vperm.slane %v1701_v26, %v3223_v17  ;;  %v1431_v29 = vpop.xlane.xlu0 %1430 }
 0x272   : > { %v1995_v21 = vperm.slane %v1431_v29, %v3144_v49 }
 0x273   : > { %v3953_v50 = vsel %vm1796_vm6, %v1841_v48, %v1840_v34  ;;  %v2214_v43 = vsel %vm2166_vm11, %v2213_v63, %v2212_v38 }
 0x274   : > { %v1996_v15 = vsel %vm1918_vm5, %v1995_v21, %v1994_v0 }
 0x278   : > { %v1558_v33 = vpop.xlane.xlu1 %1557  ;;  %v1746_v18 = vpop.xlane.xlu2 %1745 }
 0x279   : > { %v2093_v42 = vperm.slane %v1558_v33, %v3226_v27  ;;  %v2238_v3 = vperm.slane %v1746_v18, %v3223_v17  ;;  %v1704_v7 = vpop.xlane.xlu0 %1703 }
 0x27a   : > { %v2215_v35 = vperm.slane %v1704_v7, %v3252_v39 }
 0x27b   : > { %v3964_v53 = vsel %vm2051_vm8, %v2093_v42, %v2092_v9  ;;  %v2239_v52 = vsel %vm2166_vm11, %v2238_v3, %v2237_v8 }
 0x27c   : > { %v2216_v55 = vsel %vm2170_vm12, %v2215_v35, %v2214_v43 }
 0x27d   : > { %v3970_v56 = vsel %vm1843_vm9, %v2216_v55, %v3837_v12 }
 0x280   : > { %v1389_v46 = vpop.xlane.xlu1 %1388  ;;  %v1392_v24 = vpop.xlane.xlu2 %1391 }
 0x281   : > { %v1749_v31 = vpop.xlane.xlu0 %1748  ;;  %v1972_v47 = vperm.slane %v1389_v46, %v3193_v58  ;;  %v1974_v44 = vperm.slane %v1392_v24, %v3141_v57 }
 0x282   : > { %v2240_v37 = vperm.slane %v1749_v31, %v3252_v39 }
 0x283   : > { %v1973_v59 = vsel %vm1922_vm7, %v1972_v47, %v1971_v22 }
 0x284   : > { %v3976_v5 = vsel %vm2170_vm12, %v2240_v37, %v2239_v52  ;;  %v2007_v62 = vsel %vm1845_vm10, %v1973_v59, %v3900_v30 }
 0x288   : > { %v1434_v10 = vpop.xlane.xlu1 %1433  ;;  %v1561_v28 = vpop.xlane.xlu2 %1560 }
 0x289   : > { %v1997_v12 = vperm.slane %v1434_v10, %v3193_v58  ;;  %v1395_v61 = vpop.xlane.xlu0 %1394  ;;  %v2095_v13 = vperm.slane %v1561_v28, %v3214_v4 }
 0x28a   : > { %v1975_v36 = vperm.slane %v1395_v61, %v3144_v49 }
 0x28b   : > { %v3984_v25 = vsel %vm1922_vm7, %v1997_v12, %v1996_v15 }
 0x28c   : > { %v1976_v22 = vsel %vm1918_vm5, %v1975_v36, %v1974_v44 }
 0x290   : > { %v1211_v6 = vpop.xlane.xlu1 %1210  ;;  %v1214_v23 = vpop.xlane.xlu2 %1213 }
 0x291   : > { %v1828_v45 = vperm.slane %v1211_v6, %v3131_v20  ;;  %v1564_v54 = vpop.xlane.xlu0 %1563  ;;  %v1829_v30 = vperm.slane %v1214_v23, %v3168_v60 }
 0x292   : > { %v2096_v26 = vperm.slane %v1564_v54, %v3226_v27 }
 0x293   : > { %v1830_v34 = vsel %vm1796_vm6, %v1829_v30, %v1828_v45 }
 0x294   : > { %v3993_v38 = vsel %vm2051_vm8, %v2096_v26, %v2095_v13  ;;  %v1859_v48 = vsel %vm1847_vm13, %v1830_v34, %v3922_v11  ;;  %v1987_v34 = vperm.slane %v3738_v19, %v3193_v58 }
 0x298   : > { %v1531_v63 = vpop.xlane.xlu1 %1530  ;;  %v1534_v29 = vpop.xlane.xlu2 %1533 }
 0x299   : > { %v1713_v0 = vpop.xlane.xlu0 %1712 }
 0x2a0   : > { %v1707_v21 = vpop.xlane.xlu1 %1706  ;;  %v1710_v43 = vpop.xlane.xlu2 %1709 }
 0x2a1   : > { %v1722_v15 = vpop.xlane.xlu0 %1721  ;;  %v2217_v28 = vperm.slane %v1707_v21, %v3260_v40  ;;  %v2218_v36 = vperm.slane %v1710_v43, %v3223_v17  ;;  %v2080_v21 = vperm.slane %v1531_v63, %v3214_v4  ;;  %v2081_v43 = vperm.slane %v1534_v29, %v3226_v27 }
 0x2a2   : > { %v2220_v63 = vperm.slane %v1713_v0, %v3252_v39 }
 0x2a8   : > { %v1398_v33 = vpop.xlane.xlu1 %1397  ;;  %v1401_v18 = vpop.xlane.xlu2 %1400 }
 0x2a9   : > { %v1977_v9 = vperm.slane %v1398_v33, %v3193_v58  ;;  %v1217_v8 = vpop.xlane.xlu0 %1216  ;;  %v1979_v59 = vperm.slane %v1401_v18, %v3141_v57 }
 0x2ab   : > { %v1978_v42 = vsel %vm1922_vm7, %v1977_v9, %v1976_v22  ;;  %v1831_v22 = vperm.slane %v1217_v8, %v3131_v20  ;;  %v2219_v9 = vsel %vm2166_vm11, %v2218_v36, %v2217_v28 }
 0x2ac   : > { %v2008_v3 = vsel %vm1847_vm13, %v1978_v42, %v2007_v62 }
 0x2b0   : > { %v1407_v7 = vpop.xlane.xlu1 %1406  ;;  %v1223_v35 = vpop.xlane.xlu2 %1222 }
 0x2b1   : > { %v4000_v52 = vpop.xlane.xlu0 %1536  ;;  %v1982_v62 = vperm.slane %v1407_v7, %v3193_v58  ;;  %v1834_v6 = vperm.slane %v1223_v35, %v3131_v20  ;;  %v2082_v7 = vsel %vm2051_vm8, %v2081_v43, %v2080_v21 }
 0x2b2   : > { %v2083_v0 = vperm.slane %v4000_v52, %v3214_v4 }
 0x2b8   : > { %v1716_v11 = vpop.xlane.xlu1 %1715  ;;  %v1410_v55 = vpop.xlane.xlu2 %1409 }
 0x2b9   : > { %v1404_v46 = vpop.xlane.xlu0 %1403  ;;  %v1984_v54 = vperm.slane %v1410_v55, %v3141_v57  ;;  %v2222_v33 = vperm.slane %v1716_v11, %v3260_v40  ;;  %v2221_v11 = vsel %vm2170_vm12, %v2220_v63, %v2219_v9 }
 0x2ba   : > { %v1980_v37 = vperm.slane %v1404_v46, %v3144_v49  ;;  %v2255_v28 = vsel %vm1845_vm10, %v2221_v11, %v3970_v56 }
 0x2bc   : > { %v1981_v10 = vsel %vm1918_vm5, %v1980_v37, %v1979_v59 }
 0x2bd   : > { %v1983_v30 = vsel %vm1922_vm7, %v1982_v62, %v1981_v10  ;;  %v2230_v10 = vperm.slane %v3702_v2, %v3252_v39 }
 0x2c0   : > { %v1725_v24 = vpop.xlane.xlu1 %1724  ;;  %v1543_v31 = vpop.xlane.xlu2 %1542 }
 0x2c1   : > { %v1226_v47 = vpop.xlane.xlu0 %1225  ;;  %v2227_v55 = vperm.slane %v1725_v24, %v3260_v40  ;;  %v2086_v52 = vperm.slane %v1543_v31, %v3214_v4 }
 0x2c2   : > { %v1835_v12 = vperm.slane %v1226_v47, %v3168_v60 }
 0x2c8   : > { %v1719_v61 = vpop.xlane.xlu2 %1718  ;;  %v1220_v44 = vpop.xlane.xlu1 %1219 }
 0x2c9   : > { %v1413_v23 = vpop.xlane.xlu0 %1412  ;;  %v1832_v45 = vperm.slane %v1220_v44, %v3168_v60  ;;  %v2223_v13 = vperm.slane %v1719_v61, %v3223_v17  ;;  %v1836_v60 = vsel %vm1796_vm6, %v1835_v12, %v1834_v6 }
 0x2ca   : > { %v1985_v26 = vperm.slane %v1413_v23, %v3144_v49  ;;  %v2009_v49 = vsel %vm1849_vm14, %v1983_v30, %v2008_v3 }
 0x2cb   : > { %v1833_v20 = vsel %vm1796_vm6, %v1832_v45, %v1831_v22  ;;  %v2224_v29 = vsel %vm2166_vm11, %v2223_v13, %v2222_v33  ;;  %vm4121_vm6 = vcmask 1046534  }
 0x2cc   : > { %v1986_v57 = vsel %vm1918_vm5, %v1985_v26, %v1984_v54  ;;  %v1860_v18 = vsel %vm1849_vm14, %v1833_v20, %v1859_v48  ;;  %v2225_v48 = vperm.slane %v1722_v15, %v3252_v39  ;;  %vm4122_vm5 = vmmov %vm4121_vm6 }
 0x2cd   : > { %v1988_v58 = vsel %vm1922_vm7, %v1987_v34, %v1986_v57  ;;  %v1861_v19 = vsel %vm4119_vm2, %v1836_v60, %v1860_v18  ;;  %vm4124_vm7 = vmmov %vm4119_vm2 }
 0x2ce   : > { %v2010_v8 = vsel %vm4120_vm4, %v1988_v58, %v2009_v49  ;;  %v1862_v42 = vsel %vm4121_vm6, %v3832_v14, %v1861_v19  ;;  %v2226_v15 = vsel %vm2170_vm12, %v2225_v48, %v2224_v29  ;;  %vm4125_vm9 = vmmov %vm4122_vm5 }
 0x2cf   : > { %v2011_v3 = vsel %vm4122_vm5, %v3916_v32, %v2010_v8  ;;  %v1863_v35 = vsel %vm1855_vm1, %v3953_v50, %v1862_v42  ;;  %v2256_v61 = vsel %vm1847_vm13, %v2226_v15, %v2255_v28 }
 0x2d0   : > { %v2012_v14 = vsel %vm1855_vm1, %v3984_v25, %v2011_v3  ;;  %v1728_v46 = vpop.xlane.xlu2 %1727  ;;  %v1540_v47 = vpop.xlane.xlu1 %1539  ;;  %v2106_v25 = vsel %vm1845_vm10, %v2082_v7, %v3943_v51  ;;  %vm4126_vm10 = vmmov %vm4122_vm5 }
 0x2d1   : > { %v2228_v37 = vperm.slane %v1728_v46, %v3223_v17  ;;  %v1546_v32 = vpop.xlane.xlu0 %1545  ;;  %v2084_v59 = vperm.slane %v1540_v47, %v3226_v27  ;;  %v2264_v50 = vsel %vm1142_vm3, %v1863_v35, %v2012_v14  ;;  %vm4123_vm3 = vmmov %vm4119_vm2 }
 0x2d2   : > { %v2087_v24 = vperm.slane %v1546_v32, %v3226_v27 }
 0x2d3   : > { %v2229_v62 = vsel %vm2166_vm11, %v2228_v37, %v2227_v55  ;;  %v2085_v12 = vsel %vm2051_vm8, %v2084_v59, %v2083_v0 }
 0x2d4   : > { %v2231_v44 = vsel %vm2170_vm12, %v2230_v10, %v2229_v62  ;;  %v2088_v2 = vsel %vm2051_vm8, %v2087_v24, %v2086_v52  ;;  %v2107_v4 = vsel %vm1847_vm13, %v2085_v12, %v2106_v25  ;;  %vm4127_vm8 = vcmask 261120  }
 0x2d5   : > { %v2257_v27 = vsel %vm1849_vm14, %v2231_v44, %v2256_v61  ;;  %v2108_v31 = vsel %vm1849_vm14, %v2088_v2, %v2107_v4 }
 0x2d6   : > { %v2258_v51 = vsel %vm4123_vm3, %v3883_v41, %v2257_v27  ;;  %v2109_v56 = vsel %vm4124_vm7, %v3859_v1, %v2108_v31 }
 0x2d7   : > { %v2110_v36 = vsel %vm4125_vm9, %v3964_v53, %v2109_v56  ;;  %v2259_v22 = vsel %vm4126_vm10, %v3976_v5, %v2258_v51 }
 0x2d8   : > { %v1755_v6 = vpop.xlane.xlu2 %1754  ;;  %v2111_v23 = vsel %vm1855_vm1, %v3993_v38, %v2110_v36  ;;  %v1752_v45 = vpop.xlane.xlu1 %1751 }
 0x2d9   : > { %v2243_v54 = vperm.slane %v1755_v6, %v3223_v17  ;;  %v1758_v30 = vpop.xlane.xlu0 %1757  ;;  %v2267_v41 = vsel %vm4127_vm8, %v2264_v50, %v2111_v23  ;;  %v2242_v13 = vperm.slane %v1752_v45, %v3260_v40 }
 0x2da   : > { %v2245_v1 = vperm.slane %v1758_v30, %v3252_v39 }
 0x2db   : > { %v2244_v26 = vsel %vm2166_vm11, %v2243_v54, %v2242_v13 }
 0x2dc   : > { %v2246_v53 = vsel %vm2170_vm12, %v2245_v1, %v2244_v26 }
 0x2dd   : > { %v2260_v5 = vsel %vm1855_vm1, %v2246_v53, %v2259_v22 }
 0x2de   : > { %v2270_v34 = vsel %vm2268_vm15, %v2267_v41, %v2260_v5 }
 0x2df   : > { %v2274_v38 = vadd.f32 %v2272_v16, %v2270_v34 }
 0x2e1   : > { %2277 = vst.msk [vmem:[%s3770_s3 + $0x8] sm:$0xff] %vm2275_vm0, %v2274_v38 }
 0x2e2 PF: > { %s15_s17 = sadd.s32 1, %s2460_s17  }
 0x2e3   : > { %p12_p4 = scmp.ge.s32.totalorder %s15_s17, 4  }
 0x2e5   :  { %14 = sbr.rel (!%p12_p4) target bundleno = 2 (0x2), region = 66 }

</bundles_post_ra>
